<compile_context>
chip_gen: v7x
topology: tpu7x:2x2x1
jax: 0.10.0
libtpu: 0.0.40
codegen_flags: <defaults>
</compile_context>

<pallas_src>
import math
import functools

import jax
import jax.numpy as jnp
from jax.experimental import pallas as pl
from jax.experimental.pallas import tpu as pltpu


# ---------------------------------------------------------------------------
# In-kernel helpers (elementwise / reduction only)
# ---------------------------------------------------------------------------
def _erf(x):
    # Abramowitz & Stegun 7.1.26 rational approximation, |err| < 1.5e-7
    # (f32-exact) -- reproduces PyTorch's exact erf-based GELU.  exp() routes
    # to the EUP slot so this is cheap.
    a1, a2, a3, a4, a5 = 0.254829592, -0.284496736, 1.421413741, -1.453152027, 1.061405429
    p = 0.3275911
    s = jnp.where(x >= 0.0, 1.0, -1.0)
    ax = jnp.abs(x)
    t = 1.0 / (1.0 + p * ax)
    poly = ((((a5 * t + a4) * t + a3) * t + a2) * t + a1) * t
    return s * (1.0 - poly * jnp.exp(-ax * ax))


def _gelu_exact(x):
    # nn.GELU() default (approximate='none'): 0.5*x*(1+erf(x/sqrt(2)))
    return 0.5 * x * (1.0 + _erf(x * (1.0 / math.sqrt(2.0))))


def _layernorm(x, w, b, eps=1e-5):
    # PyTorch nn.LayerNorm: biased variance over the last dim, eps=1e-5.
    mu = jnp.mean(x, axis=-1, keepdims=True)
    var = jnp.mean(jnp.square(x - mu), axis=-1, keepdims=True)
    return (x - mu) * jax.lax.rsqrt(var + eps) * w + b


# ---------------------------------------------------------------------------
# Kernel 1: transformer blocks.  grid = (B, n_layer); one layer's weights are
# streamed in per grid step; x is carried in a VMEM scratch accumulator.
# ---------------------------------------------------------------------------
def gpt_blocks_kernel(x_ref,
                      ln1w_ref, ln1b_ref, wqkv_ref, bqkv_ref, wo_ref, bo_ref,
                      ln2w_ref, ln2b_ref, w1_ref, b1_ref, w2_ref, b2_ref,
                      lnfw_ref, lnfb_ref,
                      out_ref,
                      x_acc,
                      *, n_head, head_dim):
    l = pl.program_id(1)
    n_l = pl.num_programs(1)
    T, C = x_acc.shape
    H, D = n_head, head_dim

    # ---- carried activation: init from HBM input on the first layer ----
    @pl.when(l == 0)
    def _():
        x_acc[...] = x_ref[0]

    x = x_acc[...]                                   # (T, C) f32

    # Hoist per-layer 1-D params into (1, C)-style locals once.
    g1, be1 = ln1w_ref[0], ln1b_ref[0]               # (1, C)
    g2, be2 = ln2w_ref[0], ln2b_ref[0]
    b_qkv = bqkv_ref[0]                              # (1, 3C)
    b_o = bo_ref[0]                                  # (1, C)
    b_fc1 = b1_ref[0]                                # (1, 4C)
    b_fc2 = b2_ref[0]                                # (1, C)

    scale = 1.0 / math.sqrt(D)
    row = jax.lax.broadcasted_iota(jnp.int32, (T, T), 0)
    col = jax.lax.broadcasted_iota(jnp.int32, (T, T), 1)
    causal = (row >= col)[None]                      # (1, T, T) lower-triangular

    # ---- causal self-attention: x = x + proj(attn(ln1(x))) ----
    xn = _layernorm(x, g1, be1)
    qkv = jnp.dot(xn.astype(jnp.bfloat16), wqkv_ref[0],
                  preferred_element_type=jnp.float32) + b_qkv     # (T, 3C) f32

    # Pack heads as a leading batch dim: (3H, T, D) -> batched MXU matmuls.
    qkv_h = jnp.stack([qkv[:, g * D:(g + 1) * D] for g in range(3 * H)],
                      axis=0).astype(jnp.bfloat16)                # (3H, T, D)
    q_h = qkv_h[:H]
    k_h = qkv_h[H:2 * H]
    v_h = qkv_h[2 * H:]

    att = jnp.einsum('hqd,hkd->hqk', q_h, k_h,
                     preferred_element_type=jnp.float32) * scale  # (H, T, T) f32
    att = jnp.where(causal, att, -jnp.inf)
    att = att - jnp.max(att, axis=-1, keepdims=True)
    e = jnp.exp(att)
    p = e * pl.reciprocal(jnp.sum(e, axis=-1, keepdims=True), approx=True)
    y_h = jnp.einsum('hqk,hkd->hqd', p.astype(jnp.bfloat16), v_h,
                     preferred_element_type=jnp.float32)          # (H, T, D) f32

    y = jnp.concatenate([y_h[h] for h in range(H)], axis=-1)      # (T, C) f32
    y = jnp.dot(y.astype(jnp.bfloat16), wo_ref[0],
                preferred_element_type=jnp.float32) + b_o
    x = x + y

    # ---- MLP: x = x + fc2(gelu(fc1(ln2(x)))) ----
    xn2 = _layernorm(x, g2, be2)
    hdn = jnp.dot(xn2.astype(jnp.bfloat16), w1_ref[0],
                  preferred_element_type=jnp.float32) + b_fc1     # (T, 4C)
    hdn = _gelu_exact(hdn)
    m = jnp.dot(hdn.astype(jnp.bfloat16), w2_ref[0],
                preferred_element_type=jnp.float32) + b_fc2
    x = x + m

    x_acc[...] = x

    # ---- after the last layer: final LayerNorm, write bf16 activations ----
    @pl.when(l == n_l - 1)
    def _():
        xf = _layernorm(x, lnfw_ref[...], lnfb_ref[...])
        out_ref[0] = xf.astype(out_ref.dtype)


# ---------------------------------------------------------------------------
# Kernel 2: LM head matmul, tiled over the vocab dimension (lane-dense output).
# ---------------------------------------------------------------------------
def lm_head_kernel(x_ref, hw_ref, out_ref):
    out_ref[0] = jnp.dot(x_ref[0], hw_ref[...],
                         preferred_element_type=jnp.float32)


def _vocab_tile(v):
    if v % 128 != 0:
        return v                       # small / odd vocab: single full block
    for tv in (2048, 1024, 512, 256, 128):
        if v % tv == 0:
            return tv
    return v


# ---------------------------------------------------------------------------
# Parameter init (deterministic, mirrors GPT._init_weights shapes/statistics).
# Matmul weights are stored pre-transposed as (in, out) and in bf16; biases and
# LayerNorm params stay f32 and are stored as (L, 1, dim) for clean BlockSpecs.
# ---------------------------------------------------------------------------
def init_params(key, cfg):
    C, V, L, BS = cfg['n_embd'], cfg['vocab_size'], cfg['n_layer'], cfg['block_size']
    std = 0.02
    keys = jax.random.split(key, 3 + 6 * L)

    def lin(k, fi, fo):
        return (std * jax.random.normal(k, (fi, fo), jnp.float32)).astype(jnp.bfloat16)

    tok_emb = std * jax.random.normal(keys[0], (V, C), jnp.float32)
    pos_emb = std * jax.random.normal(keys[1], (1, BS, C), jnp.float32)
    headw = lin(keys[2], C, V)                                     # (C, V) bf16

    wqkv, wo, w1, w2 = [], [], [], []
    for l in range(L):
        k = keys[3 + 6 * l: 3 + 6 * (l + 1)]
        wq, wk, wv = lin(k[0], C, C), lin(k[1], C, C), lin(k[2], C, C)
        wqkv.append(jnp.concatenate([wq, wk, wv], axis=1))          # (C, 3C)
        wo.append(lin(k[3], C, C))
        w1.append(lin(k[4], C, 4 * C))
        w2.append(lin(k[5], 4 * C, C))

    st = jnp.stack
    zeros = lambda *s: jnp.zeros(s, jnp.float32)
    ones = lambda *s: jnp.ones(s, jnp.float32)
    return dict(
        tok_emb=tok_emb, pos_emb=pos_emb, headw=headw,
        wqkv=st(wqkv), bqkv=zeros(L, 1, 3 * C),
        wo=st(wo), bo=zeros(L, 1, C),
        w1=st(w1), b1=zeros(L, 1, 4 * C),
        w2=st(w2), b2=zeros(L, 1, C),
        ln1w=ones(L, 1, C), ln1b=zeros(L, 1, C),
        ln2w=ones(L, 1, C), ln2b=zeros(L, 1, C),
        lnfw=ones(1, C), lnfb=zeros(1, C),
    )


# ---------------------------------------------------------------------------
# Forward wrapper: embedding gather (glue) + two Pallas kernels + CE loss.
# ---------------------------------------------------------------------------
def gpt_forward(idx, params, cfg, targets=None):
    B, T = idx.shape
    C, V, L, H = cfg['n_embd'], cfg['vocab_size'], cfg['n_layer'], cfg['n_head']
    assert T <= cfg['block_size']
    assert C % H == 0
    D = C // H

    tok = jnp.take(params['tok_emb'], idx, axis=0)        # (B, T, C)
    pos = params['pos_emb'][:, :T, :]                     # (1, T, C)
    x = (tok + pos).astype(jnp.float32)                   # dropout p=0 -> identity

    # -------- kernel 1: transformer blocks, layer-streamed --------
    blocks_kernel = functools.partial(gpt_blocks_kernel, n_head=H, head_dim=D)

    weight_names = ('ln1w', 'ln1b', 'wqkv', 'bqkv', 'wo', 'bo',
                    'ln2w', 'ln2b', 'w1', 'b1', 'w2', 'b2')
    weight_args = [params[n] for n in weight_names]

    def xmap(b, l):   # activation / output: one batch row, resident across l
        return (b, 0, 0)

    def wmap(b, l):   # per-layer stacked weights: stream layer l
        return (l, 0, 0)

    def cmap(b, l):   # constant (final LayerNorm params)
        return (0, 0)

    in_specs = [pl.BlockSpec((1, T, C), xmap)]
    for a in weight_args:
        in_specs.append(pl.BlockSpec((1,) + tuple(a.shape[1:]), wmap))
    in_specs += [pl.BlockSpec((1, C), cmap), pl.BlockSpec((1, C), cmap)]

    cost_blocks = pl.CostEstimate(
        flops=int(B * L * (24 * T * C * C + 4 * T * T * C)),
        transcendentals=int(B * L * (H * T * T + 4 * T * C)),
        bytes_accessed=int(B * T * C * 6 + L * 24 * C * C + B * T * C * 2))

    xf = pl.pallas_call(
        blocks_kernel,
        out_shape=jax.ShapeDtypeStruct((B, T, C), jnp.bfloat16),
        grid=(B, L),
        in_specs=in_specs,
        out_specs=pl.BlockSpec((1, T, C), xmap),
        scratch_shapes=[pltpu.VMEM((T, C), jnp.float32)],
        compiler_params=pltpu.CompilerParams(
            dimension_semantics=("parallel", "arbitrary"),
            vmem_limit_bytes=48 * 1024 * 1024),
        cost_estimate=cost_blocks,
    )(x, *weight_args, params['lnfw'], params['lnfb'])

    # -------- kernel 2: LM head, tiled over vocab --------
    TV = _vocab_tile(V)
    assert V % TV == 0
    cost_head = pl.CostEstimate(
        flops=int(2 * B * T * C * V),
        transcendentals=0,
        bytes_accessed=int(C * V * 2 + B * T * C * 2 + B * T * V * 4))

    logits = pl.pallas_call(
        lm_head_kernel,
        out_shape=jax.ShapeDtypeStruct((B, T, V), jnp.float32),
        grid=(B, V // TV),
        in_specs=[pl.BlockSpec((1, T, C), lambda b, j: (b, 0, 0)),
                  pl.BlockSpec((C, TV), lambda b, j: (0, j))],
        out_specs=pl.BlockSpec((1, T, TV), lambda b, j: (b, 0, j)),
        compiler_params=pltpu.CompilerParams(
            dimension_semantics=("parallel", "parallel"),
            vmem_limit_bytes=48 * 1024 * 1024),
        cost_estimate=cost_head,
    )(xf, params['headw'])

    loss = None
    if targets is not None:
        flat_logits = logits.reshape(-1, V)
        flat_targets = targets.reshape(-1)
        logp = jax.nn.log_softmax(flat_logits, axis=-1)
        loss = -jnp.mean(logp[jnp.arange(flat_targets.shape[0]), flat_targets])
    return logits, loss


if __name__ == "__main__":
    cfg = dict(vocab_size=64, block_size=8, n_embd=32, n_head=4, n_layer=2, dropout=0.0)

    params = init_params(jax.random.PRNGKey(0), cfg)
    k_idx, k_tgt = jax.random.split(jax.random.PRNGKey(1))
    idx = jax.random.randint(k_idx, (2, 8), 0, cfg['vocab_size'], dtype=jnp.int32)
    targets = jax.random.randint(k_tgt, (2, 8), 0, cfg['vocab_size'], dtype=jnp.int32)

    logits, loss = gpt_forward(idx, params, cfg, targets=targets)
    jax.block_until_ready(logits)
    jax.block_until_ready(loss)
    assert logits.shape == (2, 8, cfg['vocab_size'])
    assert bool(jnp.isfinite(loss))
    print("KERNEL_OK")
</pallas_src>

<mosaic_0001>
module attributes {stable_mosaic.version = 11 : i64} {
  func.func @gpt_blocks_kernel(%arg0: i32, %arg1: i32, %arg2: memref<1x8x32xf32, #tpu.memory_space<vmem>>, %arg3: memref<1x1x32xf32, #tpu.memory_space<vmem>>, %arg4: memref<1x1x32xf32, #tpu.memory_space<vmem>>, %arg5: memref<1x32x96xbf16, #tpu.memory_space<vmem>>, %arg6: memref<1x1x96xf32, #tpu.memory_space<vmem>>, %arg7: memref<1x32x32xbf16, #tpu.memory_space<vmem>>, %arg8: memref<1x1x32xf32, #tpu.memory_space<vmem>>, %arg9: memref<1x1x32xf32, #tpu.memory_space<vmem>>, %arg10: memref<1x1x32xf32, #tpu.memory_space<vmem>>, %arg11: memref<1x32x128xbf16, #tpu.memory_space<vmem>>, %arg12: memref<1x1x128xf32, #tpu.memory_space<vmem>>, %arg13: memref<1x128x32xbf16, #tpu.memory_space<vmem>>, %arg14: memref<1x1x32xf32, #tpu.memory_space<vmem>>, %arg15: memref<1x32xf32, #tpu.memory_space<vmem>>, %arg16: memref<1x32xf32, #tpu.memory_space<vmem>>, %arg17: memref<1x8x32xbf16, #tpu.memory_space<vmem>>, %arg18: memref<8x32xf32, #tpu.memory_space<vmem>>) attributes {dimension_semantics = [#tpu.dimension_semantics<parallel>, #tpu.dimension_semantics<arbitrary>], iteration_bounds = array<i64: 2, 2>, scalar_prefetch = 0 : i64, scratch_operands = 1 : i64, tpu.core_type = #tpu.core_type<tc>, window_params = [{transform_indices = @transform_0, window_bounds = array<i64: 1, 8, 32>}, {transform_indices = @transform_1, window_bounds = array<i64: 1, 1, 32>}, {transform_indices = @transform_2, window_bounds = array<i64: 1, 1, 32>}, {transform_indices = @transform_3, window_bounds = array<i64: 1, 32, 96>}, {transform_indices = @transform_4, window_bounds = array<i64: 1, 1, 96>}, {transform_indices = @transform_5, window_bounds = array<i64: 1, 32, 32>}, {transform_indices = @transform_6, window_bounds = array<i64: 1, 1, 32>}, {transform_indices = @transform_7, window_bounds = array<i64: 1, 1, 32>}, {transform_indices = @transform_8, window_bounds = array<i64: 1, 1, 32>}, {transform_indices = @transform_9, window_bounds = array<i64: 1, 32, 128>}, {transform_indices = @transform_10, window_bounds = array<i64: 1, 1, 128>}, {transform_indices = @transform_11, window_bounds = array<i64: 1, 128, 32>}, {transform_indices = @transform_12, window_bounds = array<i64: 1, 1, 32>}, {pipeline_mode = #tpu.pipeline_mode<synchronous>, transform_indices = @transform_13, window_bounds = array<i64: 1, 32>}, {pipeline_mode = #tpu.pipeline_mode<synchronous>, transform_indices = @transform_14, window_bounds = array<i64: 1, 32>}, {transform_indices = @transform_15, window_bounds = array<i64: 1, 8, 32>}]} {
    %c0_i32 = arith.constant 0 : i32
    %0 = arith.cmpi eq, %arg1, %c0_i32 : i32
    %1 = arith.extui %0 : i1 to i32
    %c0_i32_0 = arith.constant 0 : i32
    %2 = arith.cmpi ne, %1, %c0_i32_0 : i32
    scf.if %2 {
      %c0_76 = arith.constant 0 : index
      %c0_77 = arith.constant 0 : index
      %c0_78 = arith.constant 0 : index
      %196 = vector.load %arg2[%c0_76, %c0_77, %c0_78] : memref<1x8x32xf32, #tpu.memory_space<vmem>>, vector<1x8x32xf32>
      %197 = vector.shape_cast %196 : vector<1x8x32xf32> to vector<8x32xf32>
      %c0_79 = arith.constant 0 : index
      %c0_80 = arith.constant 0 : index
      %198 = vector.load %arg18[%c0_79, %c0_80] : memref<8x32xf32, #tpu.memory_space<vmem>>, vector<8x32xf32>
      tpu.vector_store %arg18[%c0_79, %c0_80], %197 {strides = array<i32>} : memref<8x32xf32, #tpu.memory_space<vmem>>, vector<8x32xf32>,
    } else {
    }
    %c0 = arith.constant 0 : index
    %c0_1 = arith.constant 0 : index
    %3 = vector.load %arg18[%c0, %c0_1] : memref<8x32xf32, #tpu.memory_space<vmem>>, vector<8x32xf32>
    %c0_2 = arith.constant 0 : index
    %c0_3 = arith.constant 0 : index
    %c0_4 = arith.constant 0 : index
    %4 = vector.load %arg3[%c0_2, %c0_3, %c0_4] : memref<1x1x32xf32, #tpu.memory_space<vmem>>, vector<1x1x32xf32>
    %5 = vector.shape_cast %4 : vector<1x1x32xf32> to vector<1x32xf32>
    %c0_5 = arith.constant 0 : index
    %c0_6 = arith.constant 0 : index
    %c0_7 = arith.constant 0 : index
    %6 = vector.load %arg4[%c0_5, %c0_6, %c0_7] : memref<1x1x32xf32, #tpu.memory_space<vmem>>, vector<1x1x32xf32>
    %7 = vector.shape_cast %6 : vector<1x1x32xf32> to vector<1x32xf32>
    %c0_8 = arith.constant 0 : index
    %c0_9 = arith.constant 0 : index
    %c0_10 = arith.constant 0 : index
    %8 = vector.load %arg9[%c0_8, %c0_9, %c0_10] : memref<1x1x32xf32, #tpu.memory_space<vmem>>, vector<1x1x32xf32>
    %9 = vector.shape_cast %8 : vector<1x1x32xf32> to vector<1x32xf32>
    %c0_11 = arith.constant 0 : index
    %c0_12 = arith.constant 0 : index
    %c0_13 = arith.constant 0 : index
    %10 = vector.load %arg10[%c0_11, %c0_12, %c0_13] : memref<1x1x32xf32, #tpu.memory_space<vmem>>, vector<1x1x32xf32>
    %11 = vector.shape_cast %10 : vector<1x1x32xf32> to vector<1x32xf32>
    %c0_14 = arith.constant 0 : index
    %c0_15 = arith.constant 0 : index
    %c0_16 = arith.constant 0 : index
    %12 = vector.load %arg6[%c0_14, %c0_15, %c0_16] : memref<1x1x96xf32, #tpu.memory_space<vmem>>, vector<1x1x96xf32>
    %13 = vector.shape_cast %12 : vector<1x1x96xf32> to vector<1x96xf32>
    %c0_17 = arith.constant 0 : index
    %c0_18 = arith.constant 0 : index
    %c0_19 = arith.constant 0 : index
    %14 = vector.load %arg8[%c0_17, %c0_18, %c0_19] : memref<1x1x32xf32, #tpu.memory_space<vmem>>, vector<1x1x32xf32>
    %15 = vector.shape_cast %14 : vector<1x1x32xf32> to vector<1x32xf32>
    %c0_20 = arith.constant 0 : index
    %c0_21 = arith.constant 0 : index
    %c0_22 = arith.constant 0 : index
    %16 = vector.load %arg12[%c0_20, %c0_21, %c0_22] : memref<1x1x128xf32, #tpu.memory_space<vmem>>, vector<1x1x128xf32>
    %17 = vector.shape_cast %16 : vector<1x1x128xf32> to vector<1x128xf32>
    %c0_23 = arith.constant 0 : index
    %c0_24 = arith.constant 0 : index
    %c0_25 = arith.constant 0 : index
    %18 = vector.load %arg14[%c0_23, %c0_24, %c0_25] : memref<1x1x32xf32, #tpu.memory_space<vmem>>, vector<1x1x32xf32>
    %19 = vector.shape_cast %18 : vector<1x1x32xf32> to vector<1x32xf32>
    %20 = tpu.iota {dimensions = array<i32: 0>} : vector<8x8xi32>
    %21 = tpu.iota {dimensions = array<i32: 1>} : vector<8x8xi32>
    %22 = arith.cmpi sge, %20, %21 : vector<8x8xi32>
    %23 = vector.shape_cast %22 : vector<8x8xi1> to vector<1x8x8xi1>
    %cst = arith.constant dense<0.000000e+00> : vector<8xf32>
    %24 = vector.multi_reduction <add>, %3, %cst [1] : vector<8x32xf32> to vector<8xf32>
    %25 = vector.shape_cast %24 : vector<8xf32> to vector<8x1xf32>
    %cst_26 = arith.constant 3.200000e+01 : f32
    %26 = vector.broadcast %cst_26 : f32 to vector<8x1xf32>
    %27 = arith.divf %25, %26 : vector<8x1xf32>
    %28 = vector.broadcast %27 : vector<8x1xf32> to vector<8x32xf32>
    %29 = arith.subf %3, %28 : vector<8x32xf32>
    %30 = arith.mulf %29, %29 : vector<8x32xf32>
    %cst_27 = arith.constant dense<0.000000e+00> : vector<8xf32>
    %31 = vector.multi_reduction <add>, %30, %cst_27 [1] : vector<8x32xf32> to vector<8xf32>
    %32 = vector.shape_cast %31 : vector<8xf32> to vector<8x1xf32>
    %cst_28 = arith.constant 3.200000e+01 : f32
    %33 = vector.broadcast %cst_28 : f32 to vector<8x1xf32>
    %34 = arith.divf %32, %33 : vector<8x1xf32>
    %35 = vector.broadcast %27 : vector<8x1xf32> to vector<8x32xf32>
    %36 = arith.subf %3, %35 : vector<8x32xf32>
    %cst_29 = arith.constant 9.99999974E-6 : f32
    %37 = vector.broadcast %cst_29 : f32 to vector<8x1xf32>
    %38 = arith.addf %34, %37 : vector<8x1xf32>
    %39 = math.rsqrt %38 : vector<8x1xf32>
    %40 = vector.broadcast %39 : vector<8x1xf32> to vector<8x32xf32>
    %41 = arith.mulf %36, %40 : vector<8x32xf32>
    %42 = vector.broadcast %5 : vector<1x32xf32> to vector<8x32xf32>
    %43 = arith.mulf %41, %42 : vector<8x32xf32>
    %44 = vector.broadcast %7 : vector<1x32xf32> to vector<8x32xf32>
    %45 = arith.addf %43, %44 : vector<8x32xf32>
    %46 = arith.truncf %45 : vector<8x32xf32> to vector<8x32xbf16>
    %c0_30 = arith.constant 0 : index
    %c0_31 = arith.constant 0 : index
    %c0_32 = arith.constant 0 : index
    %47 = vector.load %arg5[%c0_30, %c0_31, %c0_32] : memref<1x32x96xbf16, #tpu.memory_space<vmem>>, vector<1x32x96xbf16>
    %48 = vector.shape_cast %47 : vector<1x32x96xbf16> to vector<32x96xbf16>
    %cst_33 = arith.constant dense<0.000000e+00> : vector<8x96xf32>
    %49 = tpu.matmul %46, %48, %cst_33 {dimension_numbers = #tpu.dot_dimension_numbers<[1], [0], [0], [1], [0, 0, 1, 1], [], []>} : vector<8x32xbf16>, vector<32x96xbf16>, vector<8x96xf32> -> vector<8x96xf32>
    %50 = vector.broadcast %13 : vector<1x96xf32> to vector<8x96xf32>
    %51 = arith.addf %49, %50 : vector<8x96xf32>
    %52 = vector.extract_strided_slice %51 {offsets = [0, 0], sizes = [8, 8], strides = [1, 1]} : vector<8x96xf32> to vector<8x8xf32>
    %53 = vector.extract_strided_slice %51 {offsets = [0, 8], sizes = [8, 8], strides = [1, 1]} : vector<8x96xf32> to vector<8x8xf32>
    %54 = vector.extract_strided_slice %51 {offsets = [0, 16], sizes = [8, 8], strides = [1, 1]} : vector<8x96xf32> to vector<8x8xf32>
    %55 = vector.extract_strided_slice %51 {offsets = [0, 24], sizes = [8, 8], strides = [1, 1]} : vector<8x96xf32> to vector<8x8xf32>
    %56 = vector.extract_strided_slice %51 {offsets = [0, 32], sizes = [8, 8], strides = [1, 1]} : vector<8x96xf32> to vector<8x8xf32>
    %57 = vector.extract_strided_slice %51 {offsets = [0, 40], sizes = [8, 8], strides = [1, 1]} : vector<8x96xf32> to vector<8x8xf32>
    %58 = vector.extract_strided_slice %51 {offsets = [0, 48], sizes = [8, 8], strides = [1, 1]} : vector<8x96xf32> to vector<8x8xf32>
    %59 = vector.extract_strided_slice %51 {offsets = [0, 56], sizes = [8, 8], strides = [1, 1]} : vector<8x96xf32> to vector<8x8xf32>
    %60 = vector.extract_strided_slice %51 {offsets = [0, 64], sizes = [8, 8], strides = [1, 1]} : vector<8x96xf32> to vector<8x8xf32>
    %61 = vector.extract_strided_slice %51 {offsets = [0, 72], sizes = [8, 8], strides = [1, 1]} : vector<8x96xf32> to vector<8x8xf32>
    %62 = vector.extract_strided_slice %51 {offsets = [0, 80], sizes = [8, 8], strides = [1, 1]} : vector<8x96xf32> to vector<8x8xf32>
    %63 = vector.extract_strided_slice %51 {offsets = [0, 88], sizes = [8, 8], strides = [1, 1]} : vector<8x96xf32> to vector<8x8xf32>
    %64 = vector.shape_cast %52 : vector<8x8xf32> to vector<1x8x8xf32>
    %65 = vector.shape_cast %53 : vector<8x8xf32> to vector<1x8x8xf32>
    %66 = vector.shape_cast %54 : vector<8x8xf32> to vector<1x8x8xf32>
    %67 = vector.shape_cast %55 : vector<8x8xf32> to vector<1x8x8xf32>
    %68 = vector.shape_cast %56 : vector<8x8xf32> to vector<1x8x8xf32>
    %69 = vector.shape_cast %57 : vector<8x8xf32> to vector<1x8x8xf32>
    %70 = vector.shape_cast %58 : vector<8x8xf32> to vector<1x8x8xf32>
    %71 = vector.shape_cast %59 : vector<8x8xf32> to vector<1x8x8xf32>
    %72 = vector.shape_cast %60 : vector<8x8xf32> to vector<1x8x8xf32>
    %73 = vector.shape_cast %61 : vector<8x8xf32> to vector<1x8x8xf32>
    %74 = vector.shape_cast %62 : vector<8x8xf32> to vector<1x8x8xf32>
    %75 = vector.shape_cast %63 : vector<8x8xf32> to vector<1x8x8xf32>
    %76 = tpu.concatenate %64, %65, %66, %67, %68, %69, %70, %71, %72, %73, %74, %75 in 0 : vector<1x8x8xf32>, vector<1x8x8xf32>, vector<1x8x8xf32>, vector<1x8x8xf32>, vector<1x8x8xf32>, vector<1x8x8xf32>, vector<1x8x8xf32>, vector<1x8x8xf32>, vector<1x8x8xf32>, vector<1x8x8xf32>, vector<1x8x8xf32>, vector<1x8x8xf32> -> vector<12x8x8xf32>
    %77 = arith.truncf %76 : vector<12x8x8xf32> to vector<12x8x8xbf16>
    %78 = vector.extract_strided_slice %77 {offsets = [0, 0, 0], sizes = [4, 8, 8], strides = [1, 1, 1]} : vector<12x8x8xbf16> to vector<4x8x8xbf16>
    %79 = vector.extract_strided_slice %77 {offsets = [4, 0, 0], sizes = [4, 8, 8], strides = [1, 1, 1]} : vector<12x8x8xbf16> to vector<4x8x8xbf16>
    %80 = vector.extract_strided_slice %77 {offsets = [8, 0, 0], sizes = [4, 8, 8], strides = [1, 1, 1]} : vector<12x8x8xbf16> to vector<4x8x8xbf16>
    "tpu.trace_start"() <{level = 10 : i32, message = "hqd,hkd->hqk"}> : () -> ()
    %cst_34 = arith.constant dense<0.000000e+00> : vector<4x8x8xf32>
    %81 = tpu.matmul %78, %79, %cst_34 {dimension_numbers = #tpu.dot_dimension_numbers<[2], [2], [1], [1], [0, 0, 0, 1, 1, 1], [0], [0]>} : vector<4x8x8xbf16>, vector<4x8x8xbf16>, vector<4x8x8xf32> -> vector<4x8x8xf32>
    "tpu.trace_stop"() : () -> ()
    %cst_35 = arith.constant 0.353553385 : f32
    %82 = vector.broadcast %cst_35 : f32 to vector<4x8x8xf32>
    %83 = arith.mulf %81, %82 : vector<4x8x8xf32>
    %cst_36 = arith.constant 0xFF800000 : f32
    %84 = vector.shape_cast %23 : vector<1x8x8xi1> to vector<1x8x8xi1>
    %85 = vector.broadcast %84 : vector<1x8x8xi1> to vector<4x8x8xi1>
    %86 = vector.broadcast %cst_36 : f32 to vector<4x8x8xf32>
    %87 = arith.select %85, %83, %86 : vector<4x8x8xi1>, vector<4x8x8xf32>
    %cst_37 = arith.constant dense<0xFF800000> : vector<4x8xf32>
    %88 = vector.multi_reduction <maximumf>, %87, %cst_37 [2] : vector<4x8x8xf32> to vector<4x8xf32>
    %89 = vector.shape_cast %88 : vector<4x8xf32> to vector<4x8x1xf32>
    %90 = vector.broadcast %89 : vector<4x8x1xf32> to vector<4x8x8xf32>
    %91 = arith.subf %87, %90 : vector<4x8x8xf32>
    %92 = math.exp %91 : vector<4x8x8xf32>
    %cst_38 = arith.constant dense<0.000000e+00> : vector<4x8xf32>
    %93 = vector.multi_reduction <add>, %92, %cst_38 [2] : vector<4x8x8xf32> to vector<4x8xf32>
    %94 = vector.shape_cast %93 : vector<4x8xf32> to vector<4x8x1xf32>
    %95 = tpu.reciprocal %94 {approx = true} : vector<4x8x1xf32> -> vector<4x8x1xf32>
    %96 = vector.broadcast %95 : vector<4x8x1xf32> to vector<4x8x8xf32>
    %97 = arith.mulf %92, %96 : vector<4x8x8xf32>
    %98 = arith.truncf %97 : vector<4x8x8xf32> to vector<4x8x8xbf16>
    "tpu.trace_start"() <{level = 10 : i32, message = "hqk,hkd->hqd"}> : () -> ()
    %cst_39 = arith.constant dense<0.000000e+00> : vector<4x8x8xf32>
    %99 = tpu.matmul %98, %80, %cst_39 {dimension_numbers = #tpu.dot_dimension_numbers<[2], [1], [1], [2], [0, 0, 0, 1, 1, 2], [0], [0]>} : vector<4x8x8xbf16>, vector<4x8x8xbf16>, vector<4x8x8xf32> -> vector<4x8x8xf32>
    "tpu.trace_stop"() : () -> ()
    %100 = vector.extract_strided_slice %99 {offsets = [0, 0, 0], sizes = [1, 8, 8], strides = [1, 1, 1]} : vector<4x8x8xf32> to vector<1x8x8xf32>
    %101 = vector.shape_cast %100 : vector<1x8x8xf32> to vector<8x8xf32>
    %102 = vector.extract_strided_slice %99 {offsets = [1, 0, 0], sizes = [1, 8, 8], strides = [1, 1, 1]} : vector<4x8x8xf32> to vector<1x8x8xf32>
    %103 = vector.shape_cast %102 : vector<1x8x8xf32> to vector<8x8xf32>
    %104 = vector.extract_strided_slice %99 {offsets = [2, 0, 0], sizes = [1, 8, 8], strides = [1, 1, 1]} : vector<4x8x8xf32> to vector<1x8x8xf32>
    %105 = vector.shape_cast %104 : vector<1x8x8xf32> to vector<8x8xf32>
    %106 = vector.extract_strided_slice %99 {offsets = [3, 0, 0], sizes = [1, 8, 8], strides = [1, 1, 1]} : vector<4x8x8xf32> to vector<1x8x8xf32>
    %107 = vector.shape_cast %106 : vector<1x8x8xf32> to vector<8x8xf32>
    %108 = tpu.concatenate %101, %103, %105, %107 in 1 : vector<8x8xf32>, vector<8x8xf32>, vector<8x8xf32>, vector<8x8xf32> -> vector<8x32xf32>
    %109 = arith.truncf %108 : vector<8x32xf32> to vector<8x32xbf16>
    %c0_40 = arith.constant 0 : index
    %c0_41 = arith.constant 0 : index
    %c0_42 = arith.constant 0 : index
    %110 = vector.load %arg7[%c0_40, %c0_41, %c0_42] : memref<1x32x32xbf16, #tpu.memory_space<vmem>>, vector<1x32x32xbf16>
    %111 = vector.shape_cast %110 : vector<1x32x32xbf16> to vector<32x32xbf16>
    %cst_43 = arith.constant dense<0.000000e+00> : vector<8x32xf32>
    %112 = tpu.matmul %109, %111, %cst_43 {dimension_numbers = #tpu.dot_dimension_numbers<[1], [0], [0], [1], [0, 0, 1, 1], [], []>} : vector<8x32xbf16>, vector<32x32xbf16>, vector<8x32xf32> -> vector<8x32xf32>
    %113 = vector.broadcast %15 : vector<1x32xf32> to vector<8x32xf32>
    %114 = arith.addf %112, %113 : vector<8x32xf32>
    %115 = arith.addf %3, %114 : vector<8x32xf32>
    %cst_44 = arith.constant dense<0.000000e+00> : vector<8xf32>
    %116 = vector.multi_reduction <add>, %115, %cst_44 [1] : vector<8x32xf32> to vector<8xf32>
    %117 = vector.shape_cast %116 : vector<8xf32> to vector<8x1xf32>
    %cst_45 = arith.constant 3.200000e+01 : f32
    %118 = vector.broadcast %cst_45 : f32 to vector<8x1xf32>
    %119 = arith.divf %117, %118 : vector<8x1xf32>
    %120 = vector.broadcast %119 : vector<8x1xf32> to vector<8x32xf32>
    %121 = arith.subf %115, %120 : vector<8x32xf32>
    %122 = arith.mulf %121, %121 : vector<8x32xf32>
    %cst_46 = arith.constant dense<0.000000e+00> : vector<8xf32>
    %123 = vector.multi_reduction <add>, %122, %cst_46 [1] : vector<8x32xf32> to vector<8xf32>
    %124 = vector.shape_cast %123 : vector<8xf32> to vector<8x1xf32>
    %cst_47 = arith.constant 3.200000e+01 : f32
    %125 = vector.broadcast %cst_47 : f32 to vector<8x1xf32>
    %126 = arith.divf %124, %125 : vector<8x1xf32>
    %127 = vector.broadcast %119 : vector<8x1xf32> to vector<8x32xf32>
    %128 = arith.subf %115, %127 : vector<8x32xf32>
    %cst_48 = arith.constant 9.99999974E-6 : f32
    %129 = vector.broadcast %cst_48 : f32 to vector<8x1xf32>
    %130 = arith.addf %126, %129 : vector<8x1xf32>
    %131 = math.rsqrt %130 : vector<8x1xf32>
    %132 = vector.broadcast %131 : vector<8x1xf32> to vector<8x32xf32>
    %133 = arith.mulf %128, %132 : vector<8x32xf32>
    %134 = vector.broadcast %9 : vector<1x32xf32> to vector<8x32xf32>
    %135 = arith.mulf %133, %134 : vector<8x32xf32>
    %136 = vector.broadcast %11 : vector<1x32xf32> to vector<8x32xf32>
    %137 = arith.addf %135, %136 : vector<8x32xf32>
    %138 = arith.truncf %137 : vector<8x32xf32> to vector<8x32xbf16>
    %c0_49 = arith.constant 0 : index
    %c0_50 = arith.constant 0 : index
    %c0_51 = arith.constant 0 : index
    %139 = vector.load %arg11[%c0_49, %c0_50, %c0_51] : memref<1x32x128xbf16, #tpu.memory_space<vmem>>, vector<1x32x128xbf16>
    %140 = vector.shape_cast %139 : vector<1x32x128xbf16> to vector<32x128xbf16>
    %cst_52 = arith.constant dense<0.000000e+00> : vector<8x128xf32>
    %141 = tpu.matmul %138, %140, %cst_52 {dimension_numbers = #tpu.dot_dimension_numbers<[1], [0], [0], [1], [0, 0, 1, 1], [], []>} : vector<8x32xbf16>, vector<32x128xbf16>, vector<8x128xf32> -> vector<8x128xf32>
    %142 = vector.broadcast %17 : vector<1x128xf32> to vector<8x128xf32>
    %143 = arith.addf %141, %142 : vector<8x128xf32>
    %cst_53 = arith.constant 5.000000e-01 : f32
    %144 = vector.broadcast %cst_53 : f32 to vector<8x128xf32>
    %145 = arith.mulf %144, %143 : vector<8x128xf32>
    %cst_54 = arith.constant 0.707106769 : f32
    %146 = vector.broadcast %cst_54 : f32 to vector<8x128xf32>
    %147 = arith.mulf %143, %146 : vector<8x128xf32>
    %cst_55 = arith.constant 0.000000e+00 : f32
    %148 = vector.broadcast %cst_55 : f32 to vector<8x128xf32>
    %149 = arith.cmpf oge, %147, %148 : vector<8x128xf32>
    %cst_56 = arith.constant 1.000000e+00 : f32
    %cst_57 = arith.constant -1.000000e+00 : f32
    %150 = vector.broadcast %cst_56 : f32 to vector<8x128xf32>
    %151 = vector.broadcast %cst_57 : f32 to vector<8x128xf32>
    %152 = arith.select %149, %150, %151 : vector<8x128xi1>, vector<8x128xf32>
    %153 = math.absf %147 : vector<8x128xf32>
    %cst_58 = arith.constant 0.327591091 : f32
    %154 = vector.broadcast %cst_58 : f32 to vector<8x128xf32>
    %155 = arith.mulf %154, %153 : vector<8x128xf32>
    %cst_59 = arith.constant 1.000000e+00 : f32
    %156 = vector.broadcast %cst_59 : f32 to vector<8x128xf32>
    %157 = arith.addf %156, %155 : vector<8x128xf32>
    %cst_60 = arith.constant 1.000000e+00 : f32
    %158 = vector.broadcast %cst_60 : f32 to vector<8x128xf32>
    %159 = arith.divf %158, %157 : vector<8x128xf32>
    %cst_61 = arith.constant 1.06140542 : f32
    %160 = vector.broadcast %cst_61 : f32 to vector<8x128xf32>
    %161 = arith.mulf %160, %159 : vector<8x128xf32>
    %cst_62 = arith.constant -1.45315206 : f32
    %162 = vector.broadcast %cst_62 : f32 to vector<8x128xf32>
    %163 = arith.addf %161, %162 : vector<8x128xf32>
    %164 = arith.mulf %163, %159 : vector<8x128xf32>
    %cst_63 = arith.constant 1.42141378 : f32
    %165 = vector.broadcast %cst_63 : f32 to vector<8x128xf32>
    %166 = arith.addf %164, %165 : vector<8x128xf32>
    %167 = arith.mulf %166, %159 : vector<8x128xf32>
    %cst_64 = arith.constant -0.284496725 : f32
    %168 = vector.broadcast %cst_64 : f32 to vector<8x128xf32>
    %169 = arith.addf %167, %168 : vector<8x128xf32>
    %170 = arith.mulf %169, %159 : vector<8x128xf32>
    %cst_65 = arith.constant 0.254829586 : f32
    %171 = vector.broadcast %cst_65 : f32 to vector<8x128xf32>
    %172 = arith.addf %170, %171 : vector<8x128xf32>
    %173 = arith.mulf %172, %159 : vector<8x128xf32>
    %cst_66 = arith.constant 0.000000e+00 : f32
    %174 = vector.broadcast %cst_66 : f32 to vector<8x128xf32>
    %175 = arith.subf %174, %153 : vector<8x128xf32>
    %176 = arith.mulf %175, %153 : vector<8x128xf32>
    %177 = math.exp %176 : vector<8x128xf32>
    %178 = arith.mulf %173, %177 : vector<8x128xf32>
    %cst_67 = arith.constant 1.000000e+00 : f32
    %179 = vector.broadcast %cst_67 : f32 to vector<8x128xf32>
    %180 = arith.subf %179, %178 : vector<8x128xf32>
    %181 = arith.mulf %152, %180 : vector<8x128xf32>
    %cst_68 = arith.constant 1.000000e+00 : f32
    %182 = vector.broadcast %cst_68 : f32 to vector<8x128xf32>
    %183 = arith.addf %182, %181 : vector<8x128xf32>
    %184 = arith.mulf %145, %183 : vector<8x128xf32>
    %185 = arith.truncf %184 : vector<8x128xf32> to vector<8x128xbf16>
    %c0_69 = arith.constant 0 : index
    %c0_70 = arith.constant 0 : index
    %c0_71 = arith.constant 0 : index
    %186 = vector.load %arg13[%c0_69, %c0_70, %c0_71] : memref<1x128x32xbf16, #tpu.memory_space<vmem>>, vector<1x128x32xbf16>
    %187 = vector.shape_cast %186 : vector<1x128x32xbf16> to vector<128x32xbf16>
    %cst_72 = arith.constant dense<0.000000e+00> : vector<8x32xf32>
    %188 = tpu.matmul %185, %187, %cst_72 {dimension_numbers = #tpu.dot_dimension_numbers<[1], [0], [0], [1], [0, 0, 1, 1], [], []>} : vector<8x128xbf16>, vector<128x32xbf16>, vector<8x32xf32> -> vector<8x32xf32>
    %189 = vector.broadcast %19 : vector<1x32xf32> to vector<8x32xf32>
    %190 = arith.addf %188, %189 : vector<8x32xf32>
    %191 = arith.addf %115, %190 : vector<8x32xf32>
    %c0_73 = arith.constant 0 : index
    %c0_74 = arith.constant 0 : index
    %192 = vector.load %arg18[%c0_73, %c0_74] : memref<8x32xf32, #tpu.memory_space<vmem>>, vector<8x32xf32>
    tpu.vector_store %arg18[%c0_73, %c0_74], %191 {strides = array<i32>} : memref<8x32xf32, #tpu.memory_space<vmem>>, vector<8x32xf32>,
    %c1_i32 = arith.constant 1 : i32
    %193 = arith.cmpi eq, %arg1, %c1_i32 : i32
    %194 = arith.extui %193 : i1 to i32
    %c0_i32_75 = arith.constant 0 : i32
    %195 = arith.cmpi ne, %194, %c0_i32_75 : i32
    scf.if %195 {
      %c0_76 = arith.constant 0 : index
      %c0_77 = arith.constant 0 : index
      %196 = vector.load %arg15[%c0_76, %c0_77] : memref<1x32xf32, #tpu.memory_space<vmem>>, vector<1x32xf32>
      %c0_78 = arith.constant 0 : index
      %c0_79 = arith.constant 0 : index
      %197 = vector.load %arg16[%c0_78, %c0_79] : memref<1x32xf32, #tpu.memory_space<vmem>>, vector<1x32xf32>
      %cst_80 = arith.constant dense<0.000000e+00> : vector<8xf32>
      %198 = vector.multi_reduction <add>, %191, %cst_80 [1] : vector<8x32xf32> to vector<8xf32>
      %199 = vector.shape_cast %198 : vector<8xf32> to vector<8x1xf32>
      %cst_81 = arith.constant 3.200000e+01 : f32
      %200 = vector.broadcast %cst_81 : f32 to vector<8x1xf32>
      %201 = arith.divf %199, %200 : vector<8x1xf32>
      %202 = vector.broadcast %201 : vector<8x1xf32> to vector<8x32xf32>
      %203 = arith.subf %191, %202 : vector<8x32xf32>
      %204 = arith.mulf %203, %203 : vector<8x32xf32>
      %cst_82 = arith.constant dense<0.000000e+00> : vector<8xf32>
      %205 = vector.multi_reduction <add>, %204, %cst_82 [1] : vector<8x32xf32> to vector<8xf32>
      %206 = vector.shape_cast %205 : vector<8xf32> to vector<8x1xf32>
      %cst_83 = arith.constant 3.200000e+01 : f32
      %207 = vector.broadcast %cst_83 : f32 to vector<8x1xf32>
      %208 = arith.divf %206, %207 : vector<8x1xf32>
      %209 = vector.broadcast %201 : vector<8x1xf32> to vector<8x32xf32>
      %210 = arith.subf %191, %209 : vector<8x32xf32>
      %cst_84 = arith.constant 9.99999974E-6 : f32
      %211 = vector.broadcast %cst_84 : f32 to vector<8x1xf32>
      %212 = arith.addf %208, %211 : vector<8x1xf32>
      %213 = math.rsqrt %212 : vector<8x1xf32>
      %214 = vector.broadcast %213 : vector<8x1xf32> to vector<8x32xf32>
      %215 = arith.mulf %210, %214 : vector<8x32xf32>
      %216 = vector.broadcast %196 : vector<1x32xf32> to vector<8x32xf32>
      %217 = arith.mulf %215, %216 : vector<8x32xf32>
      %218 = vector.broadcast %197 : vector<1x32xf32> to vector<8x32xf32>
      %219 = arith.addf %217, %218 : vector<8x32xf32>
      %220 = arith.truncf %219 : vector<8x32xf32> to vector<8x32xbf16>
      %c0_85 = arith.constant 0 : index
      %c0_86 = arith.constant 0 : index
      %c0_87 = arith.constant 0 : index
      %221 = vector.load %arg17[%c0_85, %c0_86, %c0_87] : memref<1x8x32xbf16, #tpu.memory_space<vmem>>, vector<1x8x32xbf16>
      %222 = vector.shape_cast %221 : vector<1x8x32xbf16> to vector<8x32xbf16>
      %223 = vector.shape_cast %220 : vector<8x32xbf16> to vector<1x8x32xbf16>
      tpu.vector_store %arg17[%c0_85, %c0_86, %c0_87], %223 {strides = array<i32>} : memref<1x8x32xbf16, #tpu.memory_space<vmem>>, vector<1x8x32xbf16>,
    } else {
    }
    return
  }
  func.func @transform_0(%arg0: i32, %arg1: i32) -> (i32, i32, i32) {
    %c0_i32 = arith.constant 0 : i32
    %c0_i32_0 = arith.constant 0 : i32
    %c0_i32_1 = arith.constant 0 : i32
    return %arg0, %c0_i32, %c0_i32_0 : i32, i32, i32
  }
  func.func @transform_1(%arg0: i32, %arg1: i32) -> (i32, i32, i32) {
    %c0_i32 = arith.constant 0 : i32
    %c0_i32_0 = arith.constant 0 : i32
    %c0_i32_1 = arith.constant 0 : i32
    return %arg1, %c0_i32, %c0_i32_0 : i32, i32, i32
  }
  func.func @transform_2(%arg0: i32, %arg1: i32) -> (i32, i32, i32) {
    %c0_i32 = arith.constant 0 : i32
    %c0_i32_0 = arith.constant 0 : i32
    %c0_i32_1 = arith.constant 0 : i32
    return %arg1, %c0_i32, %c0_i32_0 : i32, i32, i32
  }
  func.func @transform_3(%arg0: i32, %arg1: i32) -> (i32, i32, i32) {
    %c0_i32 = arith.constant 0 : i32
    %c0_i32_0 = arith.constant 0 : i32
    %c0_i32_1 = arith.constant 0 : i32
    return %arg1, %c0_i32, %c0_i32_0 : i32, i32, i32
  }
  func.func @transform_4(%arg0: i32, %arg1: i32) -> (i32, i32, i32) {
    %c0_i32 = arith.constant 0 : i32
    %c0_i32_0 = arith.constant 0 : i32
    %c0_i32_1 = arith.constant 0 : i32
    return %arg1, %c0_i32, %c0_i32_0 : i32, i32, i32
  }
  func.func @transform_5(%arg0: i32, %arg1: i32) -> (i32, i32, i32) {
    %c0_i32 = arith.constant 0 : i32
    %c0_i32_0 = arith.constant 0 : i32
    %c0_i32_1 = arith.constant 0 : i32
    return %arg1, %c0_i32, %c0_i32_0 : i32, i32, i32
  }
  func.func @transform_6(%arg0: i32, %arg1: i32) -> (i32, i32, i32) {
    %c0_i32 = arith.constant 0 : i32
    %c0_i32_0 = arith.constant 0 : i32
    %c0_i32_1 = arith.constant 0 : i32
    return %arg1, %c0_i32, %c0_i32_0 : i32, i32, i32
  }
  func.func @transform_7(%arg0: i32, %arg1: i32) -> (i32, i32, i32) {
    %c0_i32 = arith.constant 0 : i32
    %c0_i32_0 = arith.constant 0 : i32
    %c0_i32_1 = arith.constant 0 : i32
    return %arg1, %c0_i32, %c0_i32_0 : i32, i32, i32
  }
  func.func @transform_8(%arg0: i32, %arg1: i32) -> (i32, i32, i32) {
    %c0_i32 = arith.constant 0 : i32
    %c0_i32_0 = arith.constant 0 : i32
    %c0_i32_1 = arith.constant 0 : i32
    return %arg1, %c0_i32, %c0_i32_0 : i32, i32, i32
  }
  func.func @transform_9(%arg0: i32, %arg1: i32) -> (i32, i32, i32) {
    %c0_i32 = arith.constant 0 : i32
    %c0_i32_0 = arith.constant 0 : i32
    %c0_i32_1 = arith.constant 0 : i32
    return %arg1, %c0_i32, %c0_i32_0 : i32, i32, i32
  }
  func.func @transform_10(%arg0: i32, %arg1: i32) -> (i32, i32, i32) {
    %c0_i32 = arith.constant 0 : i32
    %c0_i32_0 = arith.constant 0 : i32
    %c0_i32_1 = arith.constant 0 : i32
    return %arg1, %c0_i32, %c0_i32_0 : i32, i32, i32
  }
  func.func @transform_11(%arg0: i32, %arg1: i32) -> (i32, i32, i32) {
    %c0_i32 = arith.constant 0 : i32
    %c0_i32_0 = arith.constant 0 : i32
    %c0_i32_1 = arith.constant 0 : i32
    return %arg1, %c0_i32, %c0_i32_0 : i32, i32, i32
  }
  func.func @transform_12(%arg0: i32, %arg1: i32) -> (i32, i32, i32) {
    %c0_i32 = arith.constant 0 : i32
    %c0_i32_0 = arith.constant 0 : i32
    %c0_i32_1 = arith.constant 0 : i32
    return %arg1, %c0_i32, %c0_i32_0 : i32, i32, i32
  }
  func.func @transform_13(%arg0: i32, %arg1: i32) -> (i32, i32) {
    %c0_i32 = arith.constant 0 : i32
    %c0_i32_0 = arith.constant 0 : i32
    %c0_i32_1 = arith.constant 0 : i32
    return %c0_i32, %c0_i32_0 : i32, i32
  }
  func.func @transform_14(%arg0: i32, %arg1: i32) -> (i32, i32) {
    %c0_i32 = arith.constant 0 : i32
    %c0_i32_0 = arith.constant 0 : i32
    %c0_i32_1 = arith.constant 0 : i32
    return %c0_i32, %c0_i32_0 : i32, i32
  }
  func.func @transform_15(%arg0: i32, %arg1: i32) -> (i32, i32, i32) {
    %c0_i32 = arith.constant 0 : i32
    %c0_i32_0 = arith.constant 0 : i32
    %c0_i32_1 = arith.constant 0 : i32
    return %arg0, %c0_i32, %c0_i32_0 : i32, i32, i32
  }
}

</mosaic_0001>

<bundles_post_ra>
// kernel: tpu_custom_call.1
= control target key start
LH: loop header
LB: loop body
LE: loop exit
PB: predicated region body
PF: predicated region fallthrough
CT: control target
= control target key end

     0   :  { %s2717_s0 = inlined_call_operand.vmem [shape: f32[2,8,32], index: 0, kind: input, shape index: {}]   ;;  %s2718_s1 = inlined_call_operand.vmem [shape: f32[2,1,32], index: 1, kind: input, shape index: {}]   ;;  %s2719_s2 = inlined_call_operand.vmem [shape: f32[2,1,32], index: 2, kind: input, shape index: {}]   ;;  %s2720_s3 = inlined_call_operand.vmem [shape: bf16[2,32,96], index: 3, kind: input, shape index: {}]   ;;  %s2721_s4 = inlined_call_operand.vmem [shape: f32[2,1,96], index: 4, kind: input, shape index: {}]   ;;  %s2722_s5 = inlined_call_operand.vmem [shape: bf16[2,32,32], index: 5, kind: input, shape index: {}]   ;;  %s2723_s6 = inlined_call_operand.vmem [shape: f32[2,1,32], index: 6, kind: input, shape index: {}]   ;;  %s2724_s7 = inlined_call_operand.vmem [shape: f32[2,1,32], index: 7, kind: input, shape index: {}]   ;;  %s2725_s8 = inlined_call_operand.vmem [shape: f32[2,1,32], index: 8, kind: input, shape index: {}]   ;;  %s2726_s9 = inlined_call_operand.vmem [shape: bf16[2,32,128], index: 9, kind: input, shape index: {}]   ;;  %s2727_s10 = inlined_call_operand.vmem [shape: f32[2,1,128], index: 10, kind: input, shape index: {}]   ;;  %s2728_s11 = inlined_call_operand.vmem [shape: bf16[2,128,32], index: 11, kind: input, shape index: {}]   ;;  %s2729_s12 = inlined_call_operand.vmem [shape: f32[2,1,32], index: 12, kind: input, shape index: {}]   ;;  %s2730_s13 = inlined_call_operand.vmem [shape: f32[1,32], index: 13, kind: input, shape index: {}]   ;;  %s2731_s14 = inlined_call_operand.vmem [shape: f32[1,32], index: 14, kind: input, shape index: {}]   ;;  %s2732_s15 = inlined_call_operand.hbm [shape: bf16[2,8,32], index: 15, kind: output, shape index: {}]  }
   0x1   :  { %2748 = sst [smem:[#allocation19_spill]] %s2717_s0 }
   0x2   :  { %2749 = sst [smem:[#allocation20_spill]] %s2719_s2 }
   0x3   :  { %2750 = sst [smem:[#allocation21_spill]] %s2720_s3 }
   0x4   :  { %2751 = sst [smem:[#allocation22_spill]] %s2722_s5 }
   0x5   :  { %2752 = sst [smem:[#allocation23_spill]] %s2730_s13 }
   0x6   :  { %2753 = sst [smem:[#allocation24_spill]] %s2731_s14 }
   0x7   :  { %2754 = sst [smem:[#allocation25_spill]] %s2732_s15 }
   0x8   :  { %20 = vsyncpa [#allocation4], 0 }
   0x9   :  { %22 = vsyncpa [#allocation4 + $0x1], 0  ;;  %s2350_s18 = smov 0   ;;  %s2352_s19 = smov 0  }
   0xa   :  { %s2354_s20 = smov 0   ;;  %s2356_s21 = smov 0  }
   0xb   :  { %s2358_s22 = smov 0   ;;  %s2360_s23 = smov 0  }
   0xc   :  { %s2362_s24 = smov 0   ;;  %s2364_s25 = smov 0  }
   0xd LB: > { %2755 = sst [smem:[#allocation6_spill]] %s2222_s18  ;;  %s1842_s26 = sadd.s32 4294967295, %s2250_s25   ;;  %s2250_s25 = sphi %s2364_s25, %s28_s25   ;;  %s2246_s24 = sphi %s2362_s24, %s2798_s24   ;;  %s2242_s23 = sphi %s2360_s23, %s2797_s23   ;;  %s2238_s22 = sphi %s2358_s22, %s2796_s22   ;;  %s2234_s21 = sphi %s2356_s21, %s2795_s21   ;;  %s2230_s20 = sphi %s2354_s20, %s2794_s20   ;;  %s2226_s19 = sphi %s2352_s19, %s2793_s19   ;;  %s2222_s18 = sphi %s2350_s18, %s2792_s18  }
   0xe   : > { %2756 = sst [smem:[#allocation7_spill]] %s2226_s19  ;;  %s1843_s27 = sadd.s32 4294967294, %s2250_s25  }
   0xf   : > { %2757 = sst [smem:[#allocation8_spill]] %s2230_s20  ;;  %s37_s28 = sadd.s32 1, %s2242_s23 }
  0x10   : > { %2758 = sst [smem:[#allocation9_spill]] %s2234_s21  ;;  %p38_p0 = scmp.ge.s32.totalorder %s37_s28, 2 }
  0x11   : > { %2759 = sst [smem:[#allocation10_spill]] %s2238_s22  ;;  %s40_s29 = sadd.s32 1, %s2246_s24 }
  0x12   : > { %2760 = sst [smem:[#allocation11_spill]] %s2242_s23  ;;  %p437_p1 = scmp.ne.s32.totalorder %s2230_s20, %s2226_s19 }
  0x13   : > { %2761 = sst [smem:[#allocation12_spill]] %s2246_s24  ;;  %p438_p2 = scmp.eq.s32.totalorder %s1842_s26, 3 }
  0x14   : > { %2762 = sst [smem:[#allocation13_spill]] %s2250_s25  ;;  %s2800_s28 = smov (%p38_p0, %s37_s28), 0 }
  0x15   : > { %2763 = sst [smem:[#allocation14_spill]] %s2800_s28  ;;  %s2802_s29 = smov (!%p38_p0, %s40_s29), %s2246_s24 }
  0x16   : > { %p2399_p3 = por %p438_p2, %p437_p1  ;;  %p443_p4 = scmp.ne.s32.totalorder %s2226_s19, %s2222_s18 }
  0x17   : > { %p42_p5 = scmp.ge.s32.totalorder %s2802_s29, 2  ;;  %p444_p6 = scmp.eq.s32.totalorder %s1843_s27, 3 }
  0x18   : > { %s2764_s30 = scalar_select %p2399_p3, 1, 0 }
  0x19   : > { %p1846_p7 = scmp.ge.s32.totalorder %s2250_s25, 1  ;;  %p555_p8 = scmp.lt.s32.totalorder %s2250_s25, 5 }
  0x1a   : > { %2765 = sst [smem:[#allocation15_spill]] %s2764_s30  ;;  %s2804_s29 = smov (%p42_p5, %s2802_s29), 0 }
  0x1b   : > { %2766 = sst [smem:[#allocation16_spill]] %s2804_s29  ;;  %p2409_p9 = por %p444_p6, %p443_p4 }
  0x1c   : > { %p556_p10 = pnand %p1846_p7, %p555_p8  ;;  %s424_s17 = ssub.s32 %s2246_s24, %s2804_s29 }
  0x1d   : > { %s2767_s16 = scalar_select %p2409_p9, 1, 0 }
  0x1e   : > { %s427_s26 = sadd.s32 1, %s2230_s20  ;;  %p425_p11 = scmp.eq.s32.totalorder %s424_s17, 0 }
  0x1f   : > { %2768 = sst [smem:[#allocation17_spill]] %s2767_s16  ;;  %559 = sbr.rel (%p556_p10) target bundleno = 2941 (0xb7d), region = 80 }
  0x20   : > { %s2417_s28 = scalar_select %p425_p11, %s2230_s20, %s427_s26  }
  0x21   : > { %s2737_s27 = sand.u32 (!%p556_p10), 1, %s2226_s19   ;;  %p646_p12 = scmp.lt.s32.totalorder (!%p556_p10), %s2238_s22, 1 }
  0x22   : > { %2769 = sst [smem:[#allocation18_spill]] %s2417_s28  ;;  %s2423_s23 = sshll.u32 (!%p556_p10), %s2737_s27, 2 }
  0x23   : > { %p650_p13 = scmp.lt.s32.totalorder (!%p556_p10), %s2234_s21, 1  ;;  %s2770_s0 = sld [smem:[#allocation19_spill]] (!%p556_p10) }
  0x24   : > { %s2772_s3 = sld [smem:[#allocation21_spill]] (!%p556_p10)  ;;  %s2773_s5 = sld [smem:[#allocation22_spill]] (!%p556_p10) }
  0x25   : > { %s645_s14 = scalar_lea.vmem (!%p556_p10), [#allocation3], %s2423_s23 }
  0x26   : > { %s647_s16 = scalar_select %p646_p12, %s2238_s22, 1 }
  0x27   : > { %s2428_s18 = scalar_select %p650_p13, %s2234_s21, 1 }
  0x28   : > { %s1848_s17 = sshll.u32 %s647_s16, 3  ;;  %s2774_s22 = sld [smem:[#allocation9_spill]] }
  0x29   : > { %s649_s27 = scalar_lea.vmem %s2770_s0, %s1848_s17  ;;  %s1898_s19 = sshll.u32 %s2428_s18, 4 }
  0x2a   : > { %s2445_s13 = scalar_lea.vmem %s2772_s3, %s1898_s19  ;;  %s2454_s0 = scalar_lea.vmem %s2773_s5, %s1898_s19 }
  0x2b   : > { %s677_s3 = scalar_lea.vmem %s2725_s8, %s2428_s18  ;;  %s2471_s16 = scalar_lea.vmem %s2726_s9, %s1898_s19 }
  0x2c   : > { %s685_s29 = scalar_lea.vmem %s2727_s10, %s2428_s18  ;;  %s1901_s5 = sshll.u32 %s2428_s18, 6 }
  0x2d   : > { %s693_s15 = scalar_lea.vmem %s2729_s12, %s2428_s18  ;;  %s2485_s20 = scalar_lea.vmem %s2728_s11, %s1901_s5 }
  0x2e   : > { %p1857_p0 = scmp.ne.s32.totalorder %s2774_s22, 0 }
  0x2f   : > { %v699_v0 = vld [vmem:[%s649_s27] sm:$0xff] (!%p1857_p0)  ;;  %vm700_vm0 = vcmask (!%p1857_p0), 261120  }
  0x30   : > { %698 = sbr.rel (%p1857_p0) target bundleno = 55 (0x37), region = 84  ;;  %701 = vst.msk [vmem:[#allocation2] sm:$0xff] (!%p1857_p0), %vm700_vm0, %v699_v0 }
  0x37 PF: > { %v2489_v1 = vld [vmem:[#allocation2] sm:$0xff]  ;;  %vm716_vm1 = vcmask 261120   ;;  %v2252_v9 = vmov 0.0   ;;  %vm2253_vm2 = vmmov 0   ;;  %v2117_v10 = vld [vmem:[%s2445_s13 + $0x8] sm:$0xff]   ;;  %s2776_s21 = sld [smem:[#allocation20_spill]]  ;;  %s2778_s28 = scalar_lea.vmem %s2721_s4, %s2428_s18  ;;  %v711_v46 = vlaneseq }
  0x38   : > { %v717_v2 = vsel %vm716_vm1, %v2489_v1, 0.0  ;;  %v2116_v8 = vld [vmem:[%s2445_s13] sm:$0xff]   ;;  %1936 = vmatprep.subr.bf16.mxu0 %v2252_v9  ;;  %1940 = vmatprep.mubr.msk.bf16.mxu0 %vm2253_vm2, %v2252_v9  ;;  %s2775_s13 = scalar_lea.vmem %s2718_s1, %s2428_s18  ;;  %s2254_s30 = smov 80   ;;  %vm857_vm3 = vcmask 64512   ;;  %vm1103_vm5 = vcmask 1043456   ;;  %vm1298_vm6 = vcmask 130048  }
  0x39   : > { %718 = vadd.xlane.f32.xlu0 %v717_v2  ;;  %1937 = vmatpush3.bf16.msra.mxu0 %v2116_v8  ;;  %v1858_v15 = vld [vmem:[%s2775_s13] ss:$0 sm:$0xff]  ;;  %s2255_s25 = smov 96   ;;  %s2256_s22 = smov 88   ;;  %v712_v47 = vshrl.u32 %v711_v46, 7  ;;  %v714_v48 = vand.u32 127, %v711_v46 }
  0x3a   : > { %1956 = vmatprep.subr.bf16.mxu1 %v2252_v9  ;;  %1938 = vmatprep.subr.bf16.mxu0 %v2252_v9  ;;  %v1860_v21 = vld [vmem:[%s2778_s28] ss:$0 sm:$0xff]  ;;  %s2257_s2 = smov 120   ;;  %s2258_s5 = smov 72   ;;  %vm1300_vm7 = vcmask 195584  }
  0x3b   : > { %1958 = vmatprep.mubr.msk.bf16.mxu1 %vm2253_vm2, %v2252_v9  ;;  %s2259_s13 = smov 112   ;;  %s2260_s19 = smov 104   ;;  %vm715_vm4 = vcmp.ge.s32.totalorder %v712_v47, %v714_v48 }
  0x3c   : > { %s2261_s27 = smov 64   ;;  %s2264_s17 = smov 56  }
  0x3d   : > { %1939 = vmatpush3.bf16.msra.mxu0 %v2117_v10  ;;  %s2777_s26 = scalar_lea.vmem %s2776_s21, %s2428_s18  ;;  %s2262_s21 = smov 48  }
  0x3e   : > { %1944 = vmatprep.subr.bf16.mxu0 %v2252_v9  ;;  %v1859_v17 = vld [vmem:[%s2777_s26] ss:$0 sm:$0xff]  ;;  %s2263_s26 = smov 40   ;;  %s2265_s24 = smov 16  }
  0x3f   : > { %s2266_s28 = smov 8  }
  0xc6   : > { %v719_v3 = vpop.xlane.xlu0 %718 }
  0xc7   : > { %v721_v4 = vmul.f32 0.03125, %v719_v3 }
  0xc9   : > { %v722_v5 = vsub.f32 %v2489_v1, %v721_v4 }
  0xcb   : > { %v723_v6 = vmul.f32 %v722_v5, %v722_v5 }
  0xcd   : > { %v724_v7 = vsel %vm716_vm1, %v723_v6, 0.0 }
  0xce   : > { %725 = vadd.xlane.f32.xlu0 %v724_v7 }
 0x15b   : > { %v726_v11 = vpop.xlane.xlu0 %725 }
 0x15c   : > { %v727_v12 = vmul.f32 0.03125, %v726_v11 }
 0x15e   : > { %v728_v13 = vadd.f32 1e-05, %v727_v12 }
 0x160   : > { %2130 = vrsqrt.f32 %v728_v13 }
 0x16a   : > { %v2131_v14 = vpop.eup %2130 }
 0x16b   : > { %v730_v16 = vmul.f32 %v2131_v14, %v722_v5 }
 0x16d   : > { %v737_v18 = vmul.f32 %v1858_v15, %v730_v16 }
 0x16f   : > { %v744_v19 = vadd.f32 %v1859_v17, %v737_v18 }
 0x171   : > { %v745_v20 = vpack.c.bf16 %v744_v19, %v744_v19 }
 0x173   : > { %1941 = vmatmul.mubr.msk.bf16.vlgmr.msra.gmra.mrb[0].mxu0 %vm716_vm1, %v745_v20 }
 0x174   : > { %1946 = vmatprep.mubr.msk.bf16.mxu0 %vm2253_vm2, %v2252_v9 }
 0x246   : > { %v805_v22 = vpop.f32.mrb[0].mxu0 }
 0x247   : > { %v2523_v23 = vadd.f32 %v1860_v21, %v805_v22  ;;  %v1942_v24 = vpop.f32.mrb[1].mxu0 }
 0x248   : > { %v808_v25 = vpop.f32.mrb[2].mxu0 }
 0x249   : > { %827 = vrot.lane.b32.xlu0 %v2523_v23, %s2254_s30  ;;  %821 = vrot.lane.b32.xlu1 %v2523_v23, %s2255_s25  ;;  %v1943_v26 = vpop.f32.mrb[3].mxu0  ;;  %v845_v36 = vpack.c.bf16 %v2523_v23, %v2523_v23  ;;  %s2267_s30 = smov 24  }
 0x24d   : > { %824 = vrot.lane.b32.xlu1 %v2523_v23, %s2256_s22  ;;  %s2779_s22 = scalar_lea.vmem %s2723_s6, %s2428_s18 }
 0x251   : > { %812 = vrot.lane.b32.xlu1 %v2523_v23, %s2257_s2 }
 0x255   : > { %830 = vrot.lane.b32.xlu1 %v2523_v23, %s2258_s5 }
 0x259   : > { %815 = vrot.lane.b32.xlu1 %v2523_v23, %s2259_s13  ;;  %s2780_s13 = scalar_lea.vmem %s2724_s7, %s2428_s18 }
 0x25d   : > { %818 = vrot.lane.b32.xlu1 %v2523_v23, %s2260_s19 }
 0x2bb   : > { %v828_v27 = vpop.permute.xlu0 %827  ;;  %v822_v28 = vpop.permute.xlu1 %821 }
 0x2bc   : > { %v851_v29 = vpack.c.bf16 %v828_v27, %v828_v27  ;;  %v849_v30 = vpack.c.bf16 %v822_v28, %v822_v28 }
 0x2be   : > { %v862_v31 = vsel %vm857_vm3, %v849_v30, 0  ;;  %v954_v32 = vsel %vm857_vm3, %v851_v29, 0 }
 0x2bf   : > { %1945 = vmatpush3.bf16.xpose.msra.mxu0 %v862_v31  ;;  %1957 = vmatpush3.bf16.xpose.msra.mxu1 %v954_v32  ;;  %v825_v33 = vpop.permute.xlu1 %824 }
 0x2c0   : > { %1950 = vmatprep.subr.bf16.mxu0 %v2252_v9  ;;  %1968 = vmatprep.subr.bf16.mxu1 %v2252_v9  ;;  %v850_v34 = vpack.c.bf16 %v825_v33, %v825_v33 }
 0x2c2   : > { %v908_v37 = vsel %vm857_vm3, %v850_v34, 0 }
 0x2c3   : > { %v813_v35 = vpop.permute.xlu1 %812 }
 0x2c4   : > { %v846_v41 = vpack.c.bf16 %v813_v35, %v813_v35 }
 0x2c6   : > { %1947 = vmatmul.mubr.msk.bf16.vlgmr.msra.gmra.mrb[4].mxu0 %vm857_vm3, %v845_v36 }
 0x2c7   : > { %v831_v38 = vpop.permute.xlu1 %830  ;;  %1951 = vmatpush3.bf16.xpose.msra.mxu0 %v908_v37  ;;  %1952 = vmatprep.mubr.msk.bf16.mxu0 %vm2253_vm2, %v2252_v9 }
 0x2c8   : > { %1962 = vmatprep.subr.bf16.mxu0 %v2252_v9  ;;  %v852_v39 = vpack.c.bf16 %v831_v38, %v831_v38 }
 0x2ca   : > { %v1000_v43 = vsel %vm857_vm3, %v852_v39, 0 }
 0x2cb   : > { %v816_v40 = vpop.permute.xlu1 %815 }
 0x2cc   : > { %v847_v42 = vpack.c.bf16 %v816_v40, %v816_v40 }
 0x2ce   : > { %1953 = vmatmul.mubr.msk.bf16.vlgmr.msra.gmra.mrb[8].mxu0 %vm857_vm3, %v846_v41  ;;  %1959 = vmatmul.mubr.msk.bf16.vlgmr.msra.gmra.mrb[0].mxu1 %vm857_vm3, %v847_v42 }
 0x2cf   : > { %1963 = vmatpush3.bf16.xpose.msra.mxu0 %v1000_v43  ;;  %1964 = vmatprep.mubr.msk.bf16.mxu0 %vm2253_vm2, %v2252_v9  ;;  %v819_v44 = vpop.permute.xlu1 %818 }
 0x2d0   : > { %1970 = vmatprep.mubr.msk.bf16.mxu1 %vm2253_vm2, %v2252_v9  ;;  %1974 = vmatprep.subr.bf16.mxu0 %v2252_v9  ;;  %v848_v45 = vpack.c.bf16 %v819_v44, %v819_v44 }
 0x2d6   : > { %1965 = vmatmul.mubr.msk.bf16.vlgmr.msra.gmra.mrb[12].mxu0 %vm857_vm3, %v848_v45 }
 0x2d7   : > { %1976 = vmatprep.mubr.msk.bf16.mxu0 %vm2253_vm2, %v2252_v9 }
 0x399   : > { %v898_v49 = vpop.f32.mrb[4].mxu0 }
 0x39a   : > { %v1042_v50 = vmul.f32 0.35355338, %v898_v49  ;;  %v1948_v51 = vpop.f32.mrb[5].mxu0 }
 0x39b   : > { %v901_v52 = vpop.f32.mrb[6].mxu0 }
 0x39c   : > { %v1949_v53 = vpop.f32.mrb[7].mxu0  ;;  %v1048_v54 = vsel %vm715_vm4, %v1042_v50, -inf }
 0x39d   : > { %v1052_v55 = vsel %vm857_vm3, %v1048_v54, -inf }
 0x39e   : > { %1053 = vmax.xlane.f32.xlu1 %v1052_v55 }
 0x3a1   : > { %v944_v56 = vpop.f32.mrb[8].mxu0  ;;  %v990_v57 = vpop.f32.mrb[0].mxu1 }
 0x3a2   : > { %v1043_v58 = vmul.f32 0.35355338, %v944_v56  ;;  %v1044_v59 = vmul.f32 0.35355338, %v990_v57  ;;  %v1954_v60 = vpop.f32.mrb[9].mxu0  ;;  %v1960_v61 = vpop.f32.mrb[1].mxu1 }
 0x3a3   : > { %v947_v62 = vpop.f32.mrb[10].mxu0  ;;  %v993_v63 = vpop.f32.mrb[2].mxu1 }
 0x3a4   : > { %v1955_v0 = vpop.f32.mrb[11].mxu0  ;;  %v1961_v2 = vpop.f32.mrb[3].mxu1  ;;  %v1050_v3 = vsel %vm715_vm4, %v1044_v59, -inf  ;;  %v1049_v4 = vsel %vm715_vm4, %v1043_v58, -inf  ;;  %v2118_v63 = vld [vmem:[%s2454_s0] sm:$0xff]  }
 0x3a5   : > { %v1058_v5 = vsel %vm857_vm3, %v1050_v3, -inf  ;;  %v1055_v6 = vsel %vm857_vm3, %v1049_v4, -inf }
 0x3a6   : > { %1059 = vmax.xlane.f32.xlu1 %v1058_v5  ;;  %1056 = vmax.xlane.f32.xlu0 %v1055_v6  ;;  %v2119_v5 = vld [vmem:[%s2454_s0 + $0x8] sm:$0xff]  }
 0x3a9   : > { %v1036_v7 = vpop.f32.mrb[12].mxu0 }
 0x3aa   : > { %v1045_v8 = vmul.f32 0.35355338, %v1036_v7  ;;  %v1966_v10 = vpop.f32.mrb[13].mxu0 }
 0x3ab   : > { %v1039_v11 = vpop.f32.mrb[14].mxu0 }
 0x3ac   : > { %v1967_v12 = vpop.f32.mrb[15].mxu0  ;;  %v1051_v13 = vsel %vm715_vm4, %v1045_v8, -inf }
 0x3ad   : > { %v1061_v14 = vsel %vm857_vm3, %v1051_v13, -inf }
 0x3ae   : > { %1062 = vmax.xlane.f32.xlu0 %v1061_v14 }
 0x3b7   : > { %833 = vrot.lane.b32.xlu1 %v2523_v23, %s2261_s27 }
 0x42b   : > { %v1054_v15 = vpop.xlane.xlu1 %1053 }
 0x42c   : > { %v1064_v16 = vsub.f32 %v1048_v54, %v1054_v15 }
 0x42e   : > { %v1068_v17 = vmul.f32 1.442695, %v1064_v16 }
 0x430   : > { %2132 = vpow2.f32 %v1068_v17 }
 0x433   : > { %v1060_v18 = vpop.xlane.xlu1 %1059  ;;  %v1057_v19 = vpop.xlane.xlu0 %1056 }
 0x434   : > { %v1066_v20 = vsub.f32 %v1050_v3, %v1060_v18  ;;  %v1065_v21 = vsub.f32 %v1049_v4, %v1057_v19 }
 0x436   : > { %v1072_v22 = vmul.f32 1.442695, %v1066_v20  ;;  %v1070_v24 = vmul.f32 1.442695, %v1065_v21 }
 0x437   : > { %v834_v25 = vpop.permute.xlu1 %833 }
 0x438   : > { %2134 = vpow2.f32 %v1072_v22  ;;  %v853_v26 = vpack.c.bf16 %v834_v25, %v834_v25 }
 0x439   : > { %2136 = vpow2.f32 %v1070_v24 }
 0x43a   : > { %v2133_v27 = vpop.eup %2132  ;;  %v1105_v28 = vsel %vm1103_vm5, %v853_v26, 0 }
 0x43b   : > { %1969 = vmatpush3.bf16.msra.mxu1 %v1105_v28  ;;  %v1063_v29 = vpop.xlane.xlu0 %1062  ;;  %v1076_v30 = vsel %vm857_vm3, %v2133_v27, 0.0 }
 0x43c   : > { %v1067_v31 = vsub.f32 %v1051_v13, %v1063_v29  ;;  %1077 = vadd.xlane.f32.xlu1 %v1076_v30  ;;  %1980 = vmatprep.subr.bf16.mxu1 %v2252_v9 }
 0x43e   : > { %v1074_v32 = vmul.f32 1.442695, %v1067_v31 }
 0x440   : > { %2138 = vpow2.f32 %v1074_v32 }
 0x442   : > { %v2135_v33 = vpop.eup %2134 }
 0x443   : > { %v2137_v34 = vpop.eup %2136  ;;  %v1082_v35 = vsel %vm857_vm3, %v2135_v33, 0.0 }
 0x444   : > { %1083 = vadd.xlane.f32.xlu1 %v1082_v35  ;;  %v1079_v36 = vsel %vm857_vm3, %v2137_v34, 0.0 }
 0x445   : > { %1080 = vadd.xlane.f32.xlu0 %v1079_v36 }
 0x44a   : > { %v2139_v37 = vpop.eup %2138 }
 0x44b   : > { %v1085_v38 = vsel %vm857_vm3, %v2139_v37, 0.0 }
 0x44c   : > { %1086 = vadd.xlane.f32.xlu0 %v1085_v38 }
 0x455   : > { %839 = vrot.lane.b32.xlu1 %v2523_v23, %s2262_s21  ;;  %s2781_s21 = sld [smem:[#allocation9_spill]] }
 0x459   : > { %842 = vrot.lane.b32.xlu1 %v2523_v23, %s2263_s26 }
 0x45b   : > { %p1891_p1 = scmp.ne.s32.totalorder %s2781_s21, 1 }
 0x45c   : > { %s2782_s26 = sld [smem:[#allocation23_spill]] (!%p1891_p1)  ;;  %vm1636_vm9 = vcmask (!%p1891_p1), 257024  }
 0x462   : > { %836 = vrot.lane.b32.xlu0 %v2523_v23, %s2264_s17 }
 0x4c9   : > { %v1078_v39 = vpop.xlane.xlu1 %1077 }
 0x4ca   : > { %2140 = vrcp.f32 %v1078_v39 }
 0x4d1   : > { %v1084_v40 = vpop.xlane.xlu1 %1083 }
 0x4d2   : > { %2142 = vrcp.f32 %v1084_v40  ;;  %v1081_v41 = vpop.xlane.xlu0 %1080  ;;  %v2120_v40 = vld [vmem:[%s2471_s16] sm:$0xff]  }
 0x4d3   : > { %2144 = vrcp.f32 %v1081_v41 }
 0x4d4   : > { %v2141_v42 = vpop.eup %2140 }
 0x4d5   : > { %v1092_v43 = vmul.f32 %v2141_v42, %v2133_v27  ;;  %v840_v44 = vpop.permute.xlu1 %839  ;;  %v1872_v27 = vld [vmem:[%s2779_s22] ss:$0 sm:$0xff] }
 0x4d6   : > { %v855_v45 = vpack.c.bf16 %v840_v44, %v840_v44 }
 0x4d7   : > { %v1096_v46 = vpack.c.bf16 %v1092_v43, %v1092_v43 }
 0x4d8   : > { %v1197_v47 = vsel %vm1103_vm5, %v855_v45, 0  ;;  %v1876_v45 = vld [vmem:[%s2780_s13] ss:$0 sm:$0xff] }
 0x4d9   : > { %1971 = vmatmul.mubr.msk.bf16.vlgmr.msra.gmra.mrb[4].mxu1 %vm857_vm3, %v1096_v46  ;;  %v1087_v48 = vpop.xlane.xlu0 %1086  ;;  %v843_v51 = vpop.permute.xlu1 %842 }
 0x4da   : > { %1981 = vmatpush3.bf16.msra.mxu1 %v1197_v47  ;;  %2146 = vrcp.f32 %v1087_v48  ;;  %1982 = vmatprep.mubr.msk.bf16.mxu1 %vm2253_vm2, %v2252_v9  ;;  %v856_v56 = vpack.c.bf16 %v843_v51, %v843_v51  ;;  %v1877_v47 = vld [vmem:[%s677_s3] ss:$0 sm:$0xff]  ;;  %v2123_v51 = vld [vmem:[%s2485_s20 + $0x8] sm:$0xff]  }
 0x4db   : > { %1992 = vmatprep.subr.bf16.mxu1 %v2252_v9 }
 0x4dc   : > { %v2143_v23 = vpop.eup %2142  ;;  %v1243_v60 = vsel %vm1103_vm5, %v856_v56, 0  ;;  %v2128_v56 = vld [vmem:[%s2485_s20 + $0x30] sm:$0xff]  }
 0x4dd   : > { %v2145_v49 = vpop.eup %2144  ;;  %v1094_v50 = vmul.f32 %v2143_v23, %v2135_v33  ;;  %v837_v52 = vpop.permute.xlu0 %836 }
 0x4de   : > { %v1093_v53 = vmul.f32 %v2145_v49, %v2137_v34  ;;  %v854_v54 = vpack.c.bf16 %v837_v52, %v837_v52  ;;  %v2124_v52 = vld [vmem:[%s2485_s20 + $0x10] sm:$0xff]  }
 0x4df   : > { %v1098_v55 = vpack.c.bf16 %v1094_v50, %v1094_v50  ;;  %v2122_v50 = vld [vmem:[%s2485_s20] sm:$0xff]  }
 0x4e0   : > { %v1151_v57 = vsel %vm1103_vm5, %v854_v54, 0  ;;  %v1097_v58 = vpack.c.bf16 %v1093_v53, %v1093_v53  ;;  %v2125_v53 = vld [vmem:[%s2485_s20 + $0x18] sm:$0xff]   ;;  %v2126_v54 = vld [vmem:[%s2485_s20 + $0x20] sm:$0xff]  }
 0x4e1   : > { %1975 = vmatpush3.bf16.msra.mxu0 %v1151_v57  ;;  %1983 = vmatmul.mubr.msk.bf16.vlgmr.msra.gmra.mrb[8].mxu1 %vm857_vm3, %v1098_v55  ;;  %v2127_v55 = vld [vmem:[%s2485_s20 + $0x28] sm:$0xff]   ;;  %v2129_v57 = vld [vmem:[%s2485_s20 + $0x38] sm:$0xff]  }
 0x4e2   : > { %1986 = vmatprep.subr.bf16.mxu0 %v2252_v9  ;;  %1996 = vmatprep.mubr.msk.bf16.mxu1 %vm2253_vm2, %v2252_v9 }
 0x4e3   : > { %1993 = vmatpush3.bf16.msra.mxu1 %v2118_v63 }
 0x4e4   : > { %v2147_v59 = vpop.eup %2146  ;;  %1977 = vmatmul.mubr.msk.bf16.vlgmr.msra.gmra.mrb[16].mxu0 %vm857_vm3, %v1097_v58  ;;  %1994 = vmatprep.subr.bf16.mxu1 %v2252_v9  ;;  %v1878_v58 = vld [vmem:[%s685_s29] ss:$0 sm:$0xff] }
 0x4e5   : > { %1987 = vmatpush3.bf16.msra.mxu0 %v1243_v60  ;;  %1988 = vmatprep.mubr.msk.bf16.mxu0 %vm2253_vm2, %v2252_v9  ;;  %v1095_v61 = vmul.f32 %v2147_v59, %v2139_v37 }
 0x4e6   : > { %2000 = vmatprep.subr.bf16.mxu0 %v2252_v9 }
 0x4e7   : > { %v1099_v62 = vpack.c.bf16 %v1095_v61, %v1095_v61  ;;  %1995 = vmatpush3.bf16.msra.mxu1 %v2119_v5 }
 0x4e8   : > { %2008 = vmatprep.subr.bf16.mxu1 %v2252_v9 }
 0x4ec   : > { %1989 = vmatmul.mubr.msk.bf16.vlgmr.msra.gmra.mrb[20].mxu0 %vm857_vm3, %v1099_v62 }
 0x4ed   : > { %2004 = vmatprep.mubr.msk.bf16.mxu0 %vm2253_vm2, %v2252_v9  ;;  %2001 = vmatpush3.bf16.msra.mxu0 %v2120_v40 }
 0x4ee   : > { %2002 = vmatprep.subr.bf16.mxu0 %v2252_v9 }
 0x5ac   : > { %v1141_v0 = vpop.f32.mrb[4].mxu1 }
 0x5ad   : > { %v1972_v2 = vpop.f32.mrb[5].mxu1 }
 0x5ae   : > { %v1144_v3 = vpop.f32.mrb[6].mxu1 }
 0x5af   : > { %v1973_v4 = vpop.f32.mrb[7].mxu1 }
 0x5b4   : > { %v1233_v6 = vpop.f32.mrb[8].mxu1 }
 0x5b5   : > { %1290 = vrot.lane.b32.xlu1 %v1233_v6, %s2265_s24  ;;  %v1984_v7 = vpop.f32.mrb[9].mxu1 }
 0x5b6   : > { %v1236_v8 = vpop.f32.mrb[10].mxu1 }
 0x5b7   : > { %v1187_v10 = vpop.f32.mrb[16].mxu0  ;;  %v1985_v11 = vpop.f32.mrb[11].mxu1 }
 0x5b8   : > { %1286 = vrot.lane.b32.xlu0 %v1187_v10, %s2266_s28  ;;  %v1978_v12 = vpop.f32.mrb[17].mxu0  ;;  %s2783_s28 = sld [smem:[#allocation24_spill]] (!%p1891_p1) }
 0x5b9   : > { %v1190_v13 = vpop.f32.mrb[18].mxu0 }
 0x5ba   : > { %v1979_v14 = vpop.f32.mrb[19].mxu0 }
 0x5bf   : > { %v1279_v15 = vpop.f32.mrb[20].mxu0 }
 0x5c0   : > { %1294 = vrot.lane.b32.xlu0 %v1279_v15, %s2267_s30  ;;  %v1990_v16 = vpop.f32.mrb[21].mxu0 }
 0x5c1   : > { %v1282_v17 = vpop.f32.mrb[22].mxu0 }
 0x5c2   : > { %v1991_v18 = vpop.f32.mrb[23].mxu0 }
 0x627   : > { %v1291_v21 = vpop.permute.xlu1 %1290 }
 0x62a   : > { %v1287_v19 = vpop.permute.xlu0 %1286 }
 0x62b   : > { %v1297_v20 = vsel %vm857_vm3, %v1141_v0, %v1287_v19 }
 0x62c   : > { %v1299_v22 = vsel %vm1298_vm6, %v1297_v20, %v1291_v21  ;;  %v2268_v21 = vmov -1.0  }
 0x632   : > { %v1295_v24 = vpop.permute.xlu0 %1294 }
 0x633   : > { %v1301_v25 = vsel %vm1300_vm7, %v1299_v22, %v1295_v24 }
 0x634   : > { %v1302_v26 = vpack.c.bf16 %v1301_v25, %v1301_v25 }
 0x636   : > { %1997 = vmatmul.mubr.msk.bf16.vlgmr.msra.gmra.mrb[12].mxu1 %vm716_vm1, %v1302_v26 }
 0x637   : > { %2024 = vmatprep.mubr.msk.bf16.mxu1 %vm2253_vm2, %v2252_v9  ;;  %2009 = vmatpush3.bf16.msra.mxu1 %v2122_v50 }
 0x638   : > { %2010 = vmatprep.subr.bf16.mxu1 %v2252_v9 }
 0x63b   : > { %2011 = vmatpush3.bf16.msra.mxu1 %v2123_v51 }
 0x63c   : > { %2012 = vmatprep.subr.bf16.mxu1 %v2252_v9 }
 0x63f   : > { %2013 = vmatpush3.bf16.msra.mxu1 %v2124_v52 }
 0x640   : > { %2014 = vmatprep.subr.bf16.mxu1 %v2252_v9 }
 0x643   : > { %2015 = vmatpush3.bf16.msra.mxu1 %v2125_v53 }
 0x644   : > { %2016 = vmatprep.subr.bf16.mxu1 %v2252_v9 }
 0x647   : > { %2017 = vmatpush3.bf16.msra.mxu1 %v2126_v54 }
 0x648   : > { %2018 = vmatprep.subr.bf16.mxu1 %v2252_v9 }
 0x64b   : > { %2019 = vmatpush3.bf16.msra.mxu1 %v2127_v55 }
 0x64c   : > { %2020 = vmatprep.subr.bf16.mxu1 %v2252_v9 }
 0x64f   : > { %2021 = vmatpush3.bf16.msra.mxu1 %v2128_v56 }
 0x650   : > { %2022 = vmatprep.subr.bf16.mxu1 %v2252_v9 }
 0x653   : > { %2023 = vmatpush3.bf16.msra.mxu1 %v2129_v57 }
 0x709   : > { %v1362_v28 = vpop.f32.mrb[12].mxu1 }
 0x70a   : > { %v1363_v29 = vadd.f32 %v1872_v27, %v1362_v28  ;;  %v1998_v30 = vpop.f32.mrb[13].mxu1 }
 0x70b   : > { %v1365_v31 = vpop.f32.mrb[14].mxu1 }
 0x70c   : > { %v2604_v32 = vadd.f32 %v1363_v29, %v2489_v1  ;;  %v1999_v33 = vpop.f32.mrb[15].mxu1  ;;  %v2121_v1 = vld [vmem:[%s2471_s16 + $0x8] sm:$0xff]   ;;  %v1882_v29 = vld [vmem:[%s693_s15] ss:$0 sm:$0xff] }
 0x70d   : > { %2003 = vmatpush3.bf16.msra.mxu0 %v2121_v1 }
 0x70e   : > { %v1369_v34 = vsel %vm716_vm1, %v2604_v32, 0.0 }
 0x70f   : > { %1370 = vadd.xlane.f32.xlu1 %v1369_v34 }
 0x79c   : > { %v1371_v35 = vpop.xlane.xlu1 %1370 }
 0x79d   : > { %v1372_v36 = vmul.f32 0.03125, %v1371_v35 }
 0x79f   : > { %v1373_v37 = vsub.f32 %v2604_v32, %v1372_v36 }
 0x7a1   : > { %v1374_v38 = vmul.f32 %v1373_v37, %v1373_v37 }
 0x7a3   : > { %v1375_v39 = vsel %vm716_vm1, %v1374_v38, 0.0 }
 0x7a4   : > { %1376 = vadd.xlane.f32.xlu0 %v1375_v39 }
 0x831   : > { %v1377_v41 = vpop.xlane.xlu0 %1376 }
 0x832   : > { %v1378_v42 = vmul.f32 0.03125, %v1377_v41 }
 0x834   : > { %v1379_v43 = vadd.f32 1e-05, %v1378_v42 }
 0x836   : > { %2148 = vrsqrt.f32 %v1379_v43 }
 0x840   : > { %v2149_v44 = vpop.eup %2148 }
 0x841   : > { %v1381_v46 = vmul.f32 %v2149_v44, %v1373_v37 }
 0x843   : > { %v1388_v48 = vmul.f32 %v1876_v45, %v1381_v46  ;;  %v1892_v45 = vld [vmem:[%s2782_s26] ss:$0 sm:$0xff] (!%p1891_p1) }
 0x845   : > { %v1395_v23 = vadd.f32 %v1877_v47, %v1388_v48  ;;  %v1893_v47 = vld [vmem:[%s2783_s28] ss:$0 sm:$0xff] (!%p1891_p1) }
 0x847   : > { %v1396_v49 = vpack.c.bf16 %v1395_v23, %v1395_v23 }
 0x849   : > { %2005 = vmatmul.mubr.msk.bf16.vlgmr.msra.gmra.mrb[24].mxu0 %vm716_vm1, %v1396_v49 }
 0x91c   : > { %v1456_v59 = vpop.f32.mrb[24].mxu0 }
 0x91d   : > { %v1457_v60 = vadd.f32 %v1878_v58, %v1456_v59  ;;  %v2006_v61 = vpop.f32.mrb[25].mxu0 }
 0x91e   : > { %v1459_v62 = vpop.f32.mrb[26].mxu0 }
 0x91f   : > { %v1463_v63 = vmul.f32 0.70710677, %v1457_v60  ;;  %v2007_v0 = vpop.f32.mrb[27].mxu0  ;;  %v1462_v25 = vmul.f32 0.5, %v1457_v60 }
 0x921   : > { %v1466_v2 = vand.u32 2147483647, %v1463_v63  ;;  %vm1464_vm8 = vcmp.ge.f32.partialorder %v1463_v63, 0.0 }
 0x922   : > { %v1465_v22 = vsel %vm1464_vm8, 1.0, %v2268_v21 }
 0x923   : > { %v1467_v3 = vmul.f32 0.3275911, %v1466_v2  ;;  %v1480_v5 = vsub.f32 0.0, %v1466_v2 }
 0x925   : > { %v1468_v4 = vadd.f32 1.0, %v1467_v3  ;;  %v1481_v9 = vmul.f32 %v1480_v5, %v1466_v2 }
 0x927   : > { %2150 = vrcp.f32 %v1468_v4  ;;  %v1482_v10 = vmul.f32 1.442695, %v1481_v9 }
 0x929   : > { %2152 = vpow2.f32 %v1482_v10 }
 0x931   : > { %v2151_v6 = vpop.eup %2150 }
 0x932   : > { %v1471_v7 = vmul.f32 1.0614054, %v2151_v6 }
 0x933   : > { %v2153_v18 = vpop.eup %2152 }
 0x934   : > { %v1472_v8 = vadd.f32 -1.4531521, %v1471_v7 }
 0x936   : > { %v1473_v11 = vmul.f32 %v2151_v6, %v1472_v8 }
 0x938   : > { %v1474_v12 = vadd.f32 1.4214138, %v1473_v11 }
 0x93a   : > { %v1475_v13 = vmul.f32 %v2151_v6, %v1474_v12 }
 0x93c   : > { %v1476_v14 = vadd.f32 -0.28449672, %v1475_v13 }
 0x93e   : > { %v1477_v15 = vmul.f32 %v2151_v6, %v1476_v14 }
 0x940   : > { %v1478_v16 = vadd.f32 0.2548296, %v1477_v15 }
 0x942   : > { %v1479_v17 = vmul.f32 %v2151_v6, %v1478_v16 }
 0x944   : > { %v1484_v19 = vmul.f32 %v2153_v18, %v1479_v17 }
 0x946   : > { %v1485_v20 = vsub.f32 1.0, %v1484_v19 }
 0x948   : > { %v1486_v24 = vmul.f32 %v1485_v20, %v1465_v22 }
 0x94a   : > { %v1487_v26 = vadd.f32 1.0, %v1486_v24 }
 0x94c   : > { %v1488_v27 = vmul.f32 %v1487_v26, %v1462_v25 }
 0x94e   : > { %v1489_v28 = vpack.c.bf16 %v1488_v27, %v1488_v27 }
 0x950   : > { %2025 = vmatmul.mubr.bf16.vlgmr.msra.gmra.mrb[16].mxu1 %v1489_v28 }
 0xa22   : > { %1605 = sbr.rel (%p1891_p1) target bundleno = 2916 (0xb64), region = 88 }
 0xa23   : > { %v1594_v30 = vpop.f32.mrb[16].mxu1 }
 0xa24   : > { %v1595_v31 = vadd.f32 %v1882_v29, %v1594_v30  ;;  %v2026_v33 = vpop.f32.mrb[17].mxu1 }
 0xa25   : > { %v1597_v34 = vpop.f32.mrb[18].mxu1 }
 0xa26   : > { %v1600_v35 = vadd.f32 %v1595_v31, %v2604_v32  ;;  %v2027_v36 = vpop.f32.mrb[19].mxu1 }
 0xa28   : > { %1601 = vst.msk [vmem:[#allocation2] sm:$0xff] %vm716_vm1, %v1600_v35  ;;  %v1608_v37 = vsel (!%p1891_p1), %vm716_vm1, %v1600_v35, 0.0 }
 0xa29   : > { %1609 = vadd.xlane.f32.xlu0 %v1608_v37 }
 0xab6   : > { %v1610_v38 = vpop.xlane.xlu0 %1609 }
 0xab7   : > { %v1611_v39 = vmul.f32 0.03125, %v1610_v38 }
 0xab9   : > { %v1612_v40 = vsub.f32 %v1600_v35, %v1611_v39 }
 0xabb   : > { %v1613_v1 = vmul.f32 %v1612_v40, %v1612_v40 }
 0xabd   : > { %v1614_v41 = vsel %vm716_vm1, %v1613_v1, 0.0 }
 0xabe   : > { %1615 = vadd.xlane.f32.xlu0 %v1614_v41 }
 0xb4b   : > { %v1616_v42 = vpop.xlane.xlu0 %1615 }
 0xb4c   : > { %v1617_v43 = vmul.f32 0.03125, %v1616_v42 }
 0xb4e   : > { %v1618_v32 = vadd.f32 1e-05, %v1617_v43 }
 0xb50   : > { %2154 = vrsqrt.f32 %v1618_v32 }
 0xb5a   : > { %v2155_v44 = vpop.eup %2154 }
 0xb5b   : > { %v1620_v46 = vmul.f32 %v2155_v44, %v1612_v40 }
 0xb5d   : > { %v1627_v48 = vmul.f32 %v1892_v45, %v1620_v46 }
 0xb5f   : > { %v1634_v23 = vadd.f32 %v1893_v47, %v1627_v48 }
 0xb61   : > { %v1635_v49 = vpack.c.bf16 %v1634_v23, %v1634_v23 }
 0xb63   : > { %1637 = vst.msk [vmem:[%s645_s14] sm:$0xf] %vm1636_vm9, %v1635_v49 }
 0xb64 PF: > { %s2784_s30 = sld [smem:[#allocation10_spill]]  ;;  %s2785_s0 = sld [smem:[#allocation7_spill]] }
 0xb65   : > { %s2787_s13 = sld [smem:[#allocation25_spill]]  ;;  %s1652_s27 = sshll.u32 %s645_s14, 4  ;;  %s1653_s27 = int_to_ptr.vmem [resolvable:$true] %s1652_s27 }
 0xb66   : > { %s2156_s20 = scalar_lea.vmem %s1653_s27, 64  ;;  %s2269_s29 = smov [#allocation3]  }
 0xb67   : > { %p2157_p2 = scmp.ne.s32.totalorder %s1653_s27, %s2156_s20  ;;  %s2160_s21 = sshll.u32 %s2269_s29, 4  ;;  %s2161_s21 = int_to_ptr.vmem [resolvable:$false] %s2160_s21 }
 0xb68   : > { %s2162_s18 = scalar_lea.vmem %s2161_s21, 128  ;;  %p2163_p6 = scmp.lt.s32.totalorder %s1653_s27, %s2161_s21 }
 0xb69   : > { %p2158_p4 = pnand %p2157_p2, %p2399_p3  ;;  %p2164_p7 = scmp.lt.s32.totalorder %s2162_s18, %s2156_s20 }
 0xb6a   : > { %s1895_s22 = sshll.u32 %s2784_s30, 6  ;;  %s2788_s3 = sand.u32 1, %s2785_s0  }
 0xb6b   : > { %s2666_s19 = scalar_lea.hbm %s2787_s13, %s1895_s22  ;;  %s1639_s16 = scalar_lea.sflag [#allocation4], %s2788_s3 }
 0xb6c   : > { %p2159_p5 = pneg %p2158_p4  ;;  %p2165_p8 = por %p2164_p7, %p2163_p6 }
 0xb6e   : > { %p2166_p10 = pnand %p2165_p8, %p2159_p5 }
 0xb70   : > { %2169 = shalt.err (!%p2166_p10)
}
 0xb71   : > { %s2170_s23 = scalar_lea.hbm %s2666_s19, 64  ;;  %s2174_s26 = scalar_lea.hbm %s2787_s13, 128 }
 0xb72   : > { %p2171_p11 = scmp.ne.s32.totalorder %s2666_s19, %s2170_s23  ;;  %p2175_p0 = scmp.lt.u32.totalorder %s2666_s19, %s2787_s13 }
 0xb73   : > { %p2176_p1 = scmp.lt.u32.totalorder %s2174_s26, %s2170_s23  ;;  %p2178_p4 = scmp.lt.u32.totalorder %s2170_s23, %s2666_s19 }
 0xb74   : > { %p2172_p12 = pnand %p2171_p11, %p2399_p3 }
 0xb75   : > { %p2177_p2 = por %p2176_p1, %p2175_p0 }
 0xb76   : > { %p2173_p13 = pneg %p2172_p12 }
 0xb77   : > { %p2179_p5 = por %p2178_p4, %p2177_p2 }
 0xb79   : > { %p2180_p6 = pnand %p2179_p5, %p2173_p13 }
 0xb7b   : > { %2183 = shalt.err (!%p2180_p6)
}
 0xb7c   : > { %2028 = dma.vmem_to_hbm [thread:$0]  (%p2399_p3), %s1653_s27, 64, %s2666_s19, %s1639_s16  }
 0xb7d PF: > { %s2789_s28 = sld [smem:[#allocation13_spill]]  ;;  %s2790_s30 = sld [smem:[#allocation6_spill]] }
 0xb83   : > { %p2034_p7 = scmp.ge.s32.totalorder %s2789_s28, 2  ;;  %s1664_s22 = sand.u32 1, %s2790_s30  }
 0xb84   : > { %s1665_s2 = scalar_lea.sflag [#allocation4], %s1664_s22 }
 0xb85   : > { %p2031_p8 = pnand %p2034_p7, %p2409_p9 }
 0xb87   : > { %2217 = dma.done.wait (!%p2031_p8), %s1665_s2, 64  }
 0xb88   : > { %2219 = vsyncadd (!%p2031_p8), %s1665_s2, 4294967232  ;;  %s28_s25 = sadd.s32 1, %s2789_s28   ;;  %s2792_s18 = sld [smem:[#allocation7_spill]] }
 0xb89   : > { %p25_p10 = scmp.ge.s32.totalorder %s28_s25, 6   ;;  %s2793_s19 = sld [smem:[#allocation8_spill]] }
 0xb8a   : > { %s2794_s20 = sld [smem:[#allocation18_spill]]  ;;  %s2795_s21 = sld [smem:[#allocation11_spill]] }
 0xb8b   : > { %s2796_s22 = sld [smem:[#allocation12_spill]]  ;;  %s2797_s23 = sld [smem:[#allocation14_spill]] }
 0xb8c   : > { %s2798_s24 = sld [smem:[#allocation16_spill]]  ;;  %27 = sbr.rel (!%p25_p10) target bundleno = 13 (0xd), region = 159 }
 0xb93   :  { %1670 = vsyncpa [#allocation4], 1 }
 0xb94   :  { %1672 = vsyncpa [#allocation4 + $0x1], 1 }

</bundles_post_ra>
